<compile_context>
chip_gen: v6e
topology: v6e:2x2x1
jax: 0.10.0
libtpu: 0.0.40
codegen_flags: <defaults>
</compile_context>

<pallas_src>
import jax
import jax.numpy as jnp
from jax.experimental import pallas as pl
from jax.experimental.pallas import tpu as pltpu

# ---- synthetic config (small shapes, consistent with the module) ----
S = 8           # seq_len
B = 2           # batch
E = 32          # n_embed
H = 4           # n_head
DH = E // H     # head_dim
FFN = 64        # ffn_dim
R = S * B       # total rows processed by the kernel
EPS = 1e-5
NORMALIZE_BEFORE = True
SCALING = DH ** (-0.5)
NEG = -1e9      # large finite negative for masking (avoids -inf/NaN)

# ---- packed small-vector slab layout: (N_VEC_ROWS, VEC_W) ----
VEC_W = 3 * E                       # widest vector (fused qkv bias); others zero-padded
(ROW_BQKV1, ROW_BQKV2, ROW_BO1, ROW_BO2,
 ROW_G1, ROW_BE1, ROW_G2, ROW_BE2, ROW_G3, ROW_BE3,
 ROW_BF1, ROW_BF2) = range(12)
N_VEC_ROWS = 12

# unfused parameter layout (weights stored transposed: (in, out))
BASE_PARAMS = [
    ("wq1", (E, E)), ("bq1", (1, E)), ("wk1", (E, E)), ("bk1", (1, E)),
    ("wv1", (E, E)), ("bv1", (1, E)), ("wo1", (E, E)), ("bo1", (1, E)),
    ("wq2", (E, E)), ("bq2", (1, E)), ("wk2", (E, E)), ("bk2", (1, E)),
    ("wv2", (E, E)), ("bv2", (1, E)), ("wo2", (E, E)), ("bo2", (1, E)),
    ("g1", (1, E)), ("be1", (1, E)), ("g2", (1, E)), ("be2", (1, E)),
    ("g3", (1, E)), ("be3", (1, E)),
    ("wf1", (E, FFN)), ("bf1", (1, FFN)), ("wf2", (FFN, E)), ("bf2", (1, E)),
]


# ----------------------------- kernel helpers -----------------------------
def _layer_norm(h, g, b):
    mu = jnp.mean(h, axis=-1, keepdims=True)
    var = jnp.mean(jnp.square(h - mu), axis=-1, keepdims=True)
    return (h - mu) * jax.lax.rsqrt(var + EPS) * g + b


def _split_heads(m):
    # (R, E) -> (H, R, DH) via static lane slices stacked along a new leading dim
    return jnp.stack([m[:, i * DH:(i + 1) * DH] for i in range(H)], axis=0)


def _attention(h, bias, wqkv, bqkv, wo, bo):
    # h: (R, E), bias: (R, R) additive (0 / -1e9), block-diagonal across batches.
    qkv = jnp.dot(h, wqkv, preferred_element_type=jnp.float32) + bqkv     # (R, 3E)
    q = _split_heads(qkv[:, 0:E] * SCALING)                               # (H, R, DH)
    k = _split_heads(qkv[:, E:2 * E])                                     # (H, R, DH)
    v = _split_heads(qkv[:, 2 * E:3 * E])                                 # (H, R, DH)
    s = jnp.einsum("hqd,hkd->hqk", q, k,
                   preferred_element_type=jnp.float32) + bias[None]       # (H, R, R)
    p = jax.nn.softmax(s, axis=-1)                                        # one softmax
    ctx = jnp.einsum("hqk,hkd->hqd", p, v,
                     preferred_element_type=jnp.float32)                  # (H, R, DH)
    ctx2d = jnp.concatenate([ctx[i] for i in range(H)], axis=-1)          # (R, E)
    return jnp.dot(ctx2d, wo, preferred_element_type=jnp.float32) + bo


# ------------------------------- the kernel --------------------------------
def _decoder_layer_kernel(x_ref, bias_ref, vec_ref,
                          wqkv1_ref, wo1_ref, wqkv2_ref, wo2_ref,
                          wf1_ref, wf2_ref, o_ref):
    x = x_ref[...]                      # (R, E)
    bias = bias_ref[...]                # (R, R)
    vec = vec_ref[...]                  # (N_VEC_ROWS, VEC_W)

    bqkv1 = vec[ROW_BQKV1:ROW_BQKV1 + 1, :]
    bqkv2 = vec[ROW_BQKV2:ROW_BQKV2 + 1, :]
    bo1 = vec[ROW_BO1:ROW_BO1 + 1, 0:E]
    bo2 = vec[ROW_BO2:ROW_BO2 + 1, 0:E]
    g1 = vec[ROW_G1:ROW_G1 + 1, 0:E]
    be1 = vec[ROW_BE1:ROW_BE1 + 1, 0:E]
    g2 = vec[ROW_G2:ROW_G2 + 1, 0:E]
    be2 = vec[ROW_BE2:ROW_BE2 + 1, 0:E]
    g3 = vec[ROW_G3:ROW_G3 + 1, 0:E]
    be3 = vec[ROW_BE3:ROW_BE3 + 1, 0:E]
    bf1 = vec[ROW_BF1:ROW_BF1 + 1, 0:FFN]
    bf2 = vec[ROW_BF2:ROW_BF2 + 1, 0:E]

    def attn_block(h, g, b, wqkv, bqkv, wo, bo):
        residual = h
        if NORMALIZE_BEFORE:
            h = _layer_norm(h, g, b)
        h = _attention(h, bias, wqkv, bqkv, wo, bo)
        h = residual + h
        if not NORMALIZE_BEFORE:
            h = _layer_norm(h, g, b)
        return h

    h = attn_block(x, g1, be1, wqkv1_ref[...], bqkv1, wo1_ref[...], bo1)
    h = attn_block(h, g2, be2, wqkv2_ref[...], bqkv2, wo2_ref[...], bo2)

    # FFN block
    residual = h
    if NORMALIZE_BEFORE:
        h = _layer_norm(h, g3, be3)
    h = jnp.maximum(
        jnp.dot(h, wf1_ref[...], preferred_element_type=jnp.float32) + bf1, 0.0)
    h = jnp.dot(h, wf2_ref[...], preferred_element_type=jnp.float32) + bf2
    h = residual + h
    if not NORMALIZE_BEFORE:
        h = _layer_norm(h, g3, be3)

    o_ref[...] = h


# ------------------------------ wrapper -------------------------------------
def _pad_row(v):
    return jnp.pad(v, ((0, 0), (0, VEC_W - v.shape[1])))


def _pack_params(P):
    wqkv1 = jnp.concatenate([P["wq1"], P["wk1"], P["wv1"]], axis=1)   # (E, 3E)
    wqkv2 = jnp.concatenate([P["wq2"], P["wk2"], P["wv2"]], axis=1)   # (E, 3E)
    bqkv1 = jnp.concatenate([P["bq1"], P["bk1"], P["bv1"]], axis=1)   # (1, 3E)
    bqkv2 = jnp.concatenate([P["bq2"], P["bk2"], P["bv2"]], axis=1)   # (1, 3E)
    vec = jnp.concatenate(
        [bqkv1, bqkv2,
         _pad_row(P["bo1"]), _pad_row(P["bo2"]),
         _pad_row(P["g1"]), _pad_row(P["be1"]),
         _pad_row(P["g2"]), _pad_row(P["be2"]),
         _pad_row(P["g3"]), _pad_row(P["be3"]),
         _pad_row(P["bf1"]), _pad_row(P["bf2"])], axis=0)             # (12, 3E)
    return vec, wqkv1, P["wo1"], wqkv2, P["wo2"], P["wf1"], P["wf2"]


@jax.jit
def vertex_decoder_layer(x_sbe, causal_mask, pad_mask, params):
    """x_sbe: (S, B, E) f32, causal_mask: (S, S) bool, pad_mask: (B, S) bool (True = masked)."""
    # Zero-copy flatten: row r = s * B + b (no transpose, memory layout unchanged).
    x_flat = jnp.asarray(x_sbe, jnp.float32).reshape(R, E)

    # Precompute the additive attention bias for the flattened (B*S) row space:
    # block-diagonal across batches + causal + key padding. Finite negative (no -inf).
    r = jnp.arange(R)
    s_idx, b_idx = r // B, r % B
    cross_batch = b_idx[:, None] != b_idx[None, :]
    causal = causal_mask[s_idx[:, None], s_idx[None, :]]
    pad_keys = pad_mask[b_idx, s_idx]                       # padding of each key row
    mask = cross_batch | causal | pad_keys[None, :]
    bias = jnp.where(mask, NEG, 0.0).astype(jnp.float32)    # (R, R)

    vec, wqkv1, wo1, wqkv2, wo2, wf1, wf2 = _pack_params(params)

    vmem = pltpu.MemorySpace.VMEM
    out = pl.pallas_call(
        _decoder_layer_kernel,
        out_shape=jax.ShapeDtypeStruct((R, E), jnp.float32),
        in_specs=[pl.BlockSpec(memory_space=vmem)] * 9,      # whole arrays in VMEM, no grid
        out_specs=pl.BlockSpec(memory_space=vmem),
    )(x_flat, bias, vec, wqkv1, wo1, wqkv2, wo2, wf1, wf2)

    return out.reshape(S, B, E)                              # zero-copy un-flatten


# ----------------- pure-JAX reference (mirrors the PyTorch math) -----------------
def _ref_ln(h, g, b):
    mu = jnp.mean(h, axis=-1, keepdims=True)
    var = jnp.mean((h - mu) ** 2, axis=-1, keepdims=True)
    return (h - mu) / jnp.sqrt(var + EPS) * g + b


def _ref_attention(h, bias, wq, bq, wk, bk, wv, bv, wo, bo):
    # h: (S, B, E); bias: (B, S, S) additive with -inf (PyTorch semantics)
    q = (jnp.einsum("sbe,ef->sbf", h, wq) + bq) * SCALING
    k = jnp.einsum("sbe,ef->sbf", h, wk) + bk
    v = jnp.einsum("sbe,ef->sbf", h, wv) + bv
    qh = q.reshape(S, B, H, DH)
    kh = k.reshape(S, B, H, DH)
    vh = v.reshape(S, B, H, DH)
    scores = jnp.einsum("qbhd,kbhd->bhqk", qh, kh) + bias[:, None]
    p = jax.nn.softmax(scores, axis=-1)
    out = jnp.einsum("bhqk,kbhd->qbhd", p, vh).reshape(S, B, E)
    return jnp.einsum("sbe,ef->sbf", out, wo) + bo


def reference_layer(x_sbe, causal_mask, pad_mask, P):
    x = jnp.asarray(x_sbe, jnp.float32)                         # (S, B, E)
    mask = causal_mask[None] | pad_mask[:, None, :]             # (B, S, S)
    bias = jnp.where(mask, -jnp.inf, 0.0).astype(jnp.float32)

    def attn_block(h, g, b, w):
        res = h
        if NORMALIZE_BEFORE:
            h = _ref_ln(h, g, b)
        h = _ref_attention(h, bias, *w)
        h = res + h
        if not NORMALIZE_BEFORE:
            h = _ref_ln(h, g, b)
        return h

    h = attn_block(x, P["g1"], P["be1"],
                   (P["wq1"], P["bq1"], P["wk1"], P["bk1"],
                    P["wv1"], P["bv1"], P["wo1"], P["bo1"]))
    h = attn_block(h, P["g2"], P["be2"],
                   (P["wq2"], P["bq2"], P["wk2"], P["bk2"],
                    P["wv2"], P["bv2"], P["wo2"], P["bo2"]))
    res = h
    if NORMALIZE_BEFORE:
        h = _ref_ln(h, P["g3"], P["be3"])
    h = jnp.maximum(h @ P["wf1"] + P["bf1"], 0.0)
    h = h @ P["wf2"] + P["bf2"]
    h = res + h
    if not NORMALIZE_BEFORE:
        h = _ref_ln(h, P["g3"], P["be3"])
    return h


def init_params(key):
    params = {}
    for name, shape in BASE_PARAMS:
        key, sub = jax.random.split(key)
        if name in ("g1", "g2", "g3"):
            params[name] = jnp.ones(shape, jnp.float32)
        elif name in ("be1", "be2", "be3"):
            params[name] = jnp.zeros(shape, jnp.float32)
        elif name.startswith("b"):
            params[name] = 0.02 * jax.random.normal(sub, shape, jnp.float32)
        else:
            params[name] = 0.1 * jax.random.normal(sub, shape, jnp.float32)
    return params


if __name__ == "__main__":
    key = jax.random.PRNGKey(0)
    key, kx = jax.random.split(key)

    x = jax.random.normal(kx, (S, B, E), jnp.float32)           # (seq, batch, embed)
    causal_mask = jnp.triu(jnp.ones((S, S), jnp.bool_), k=1)    # True = masked (future)
    pad_mask = jnp.zeros((B, S), jnp.bool_).at[1, -2:].set(True)  # mask last 2 keys of batch 1

    params = init_params(key)

    out = vertex_decoder_layer(x, causal_mask, pad_mask, params)
    out = jax.block_until_ready(out)

    ref = reference_layer(x, causal_mask, pad_mask, params)

    assert out.shape == (S, B, E), out.shape
    max_err = float(jnp.max(jnp.abs(out - ref)))
    assert jnp.allclose(out, ref, atol=2e-4, rtol=2e-4), max_err
    print("KERNEL_OK")
</pallas_src>

<mosaic_0001>
module attributes {stable_mosaic.version = 11 : i64} {
  func.func @_decoder_layer_kernel(%arg0: memref<16x32xf32, #tpu.memory_space<vmem>>, %arg1: memref<16x16xf32, #tpu.memory_space<vmem>>, %arg2: memref<12x96xf32, #tpu.memory_space<vmem>>, %arg3: memref<32x96xf32, #tpu.memory_space<vmem>>, %arg4: memref<32x32xf32, #tpu.memory_space<vmem>>, %arg5: memref<32x96xf32, #tpu.memory_space<vmem>>, %arg6: memref<32x32xf32, #tpu.memory_space<vmem>>, %arg7: memref<32x64xf32, #tpu.memory_space<vmem>>, %arg8: memref<64x32xf32, #tpu.memory_space<vmem>>, %arg9: memref<16x32xf32, #tpu.memory_space<vmem>>) attributes {dimension_semantics = [], scalar_prefetch = 0 : i64, scratch_operands = 0 : i64, tpu.core_type = #tpu.core_type<tc>} {
    %c0 = arith.constant 0 : index
    %c0_0 = arith.constant 0 : index
    %0 = vector.load %arg0[%c0, %c0_0] : memref<16x32xf32, #tpu.memory_space<vmem>>, vector<16x32xf32>
    %c0_1 = arith.constant 0 : index
    %c0_2 = arith.constant 0 : index
    %1 = vector.load %arg1[%c0_1, %c0_2] : memref<16x16xf32, #tpu.memory_space<vmem>>, vector<16x16xf32>
    %c0_3 = arith.constant 0 : index
    %c0_4 = arith.constant 0 : index
    %2 = vector.load %arg2[%c0_3, %c0_4] : memref<12x96xf32, #tpu.memory_space<vmem>>, vector<12x96xf32>
    %3 = vector.extract_strided_slice %2 {offsets = [0, 0], sizes = [1, 96], strides = [1, 1]} : vector<12x96xf32> to vector<1x96xf32>
    %4 = vector.extract_strided_slice %2 {offsets = [1, 0], sizes = [1, 96], strides = [1, 1]} : vector<12x96xf32> to vector<1x96xf32>
    %5 = vector.extract_strided_slice %2 {offsets = [2, 0], sizes = [1, 32], strides = [1, 1]} : vector<12x96xf32> to vector<1x32xf32>
    %6 = vector.extract_strided_slice %2 {offsets = [3, 0], sizes = [1, 32], strides = [1, 1]} : vector<12x96xf32> to vector<1x32xf32>
    %7 = vector.extract_strided_slice %2 {offsets = [4, 0], sizes = [1, 32], strides = [1, 1]} : vector<12x96xf32> to vector<1x32xf32>
    %8 = vector.extract_strided_slice %2 {offsets = [5, 0], sizes = [1, 32], strides = [1, 1]} : vector<12x96xf32> to vector<1x32xf32>
    %9 = vector.extract_strided_slice %2 {offsets = [6, 0], sizes = [1, 32], strides = [1, 1]} : vector<12x96xf32> to vector<1x32xf32>
    %10 = vector.extract_strided_slice %2 {offsets = [7, 0], sizes = [1, 32], strides = [1, 1]} : vector<12x96xf32> to vector<1x32xf32>
    %11 = vector.extract_strided_slice %2 {offsets = [8, 0], sizes = [1, 32], strides = [1, 1]} : vector<12x96xf32> to vector<1x32xf32>
    %12 = vector.extract_strided_slice %2 {offsets = [9, 0], sizes = [1, 32], strides = [1, 1]} : vector<12x96xf32> to vector<1x32xf32>
    %13 = vector.extract_strided_slice %2 {offsets = [10, 0], sizes = [1, 64], strides = [1, 1]} : vector<12x96xf32> to vector<1x64xf32>
    %14 = vector.extract_strided_slice %2 {offsets = [11, 0], sizes = [1, 32], strides = [1, 1]} : vector<12x96xf32> to vector<1x32xf32>
    %c0_5 = arith.constant 0 : index
    %c0_6 = arith.constant 0 : index
    %15 = vector.load %arg3[%c0_5, %c0_6] : memref<32x96xf32, #tpu.memory_space<vmem>>, vector<32x96xf32>
    %c0_7 = arith.constant 0 : index
    %c0_8 = arith.constant 0 : index
    %16 = vector.load %arg4[%c0_7, %c0_8] : memref<32x32xf32, #tpu.memory_space<vmem>>, vector<32x32xf32>
    %cst = arith.constant dense<0.000000e+00> : vector<16xf32>
    %17 = vector.multi_reduction <add>, %0, %cst [1] : vector<16x32xf32> to vector<16xf32>
    %18 = vector.shape_cast %17 : vector<16xf32> to vector<16x1xf32>
    %cst_9 = arith.constant 3.200000e+01 : f32
    %19 = vector.broadcast %cst_9 : f32 to vector<16x1xf32>
    %20 = arith.divf %18, %19 : vector<16x1xf32>
    %21 = vector.broadcast %20 : vector<16x1xf32> to vector<16x32xf32>
    %22 = arith.subf %0, %21 : vector<16x32xf32>
    %23 = arith.mulf %22, %22 : vector<16x32xf32>
    %cst_10 = arith.constant dense<0.000000e+00> : vector<16xf32>
    %24 = vector.multi_reduction <add>, %23, %cst_10 [1] : vector<16x32xf32> to vector<16xf32>
    %25 = vector.shape_cast %24 : vector<16xf32> to vector<16x1xf32>
    %cst_11 = arith.constant 3.200000e+01 : f32
    %26 = vector.broadcast %cst_11 : f32 to vector<16x1xf32>
    %27 = arith.divf %25, %26 : vector<16x1xf32>
    %28 = vector.broadcast %20 : vector<16x1xf32> to vector<16x32xf32>
    %29 = arith.subf %0, %28 : vector<16x32xf32>
    %cst_12 = arith.constant 9.99999974E-6 : f32
    %30 = vector.broadcast %cst_12 : f32 to vector<16x1xf32>
    %31 = arith.addf %27, %30 : vector<16x1xf32>
    %32 = math.rsqrt %31 : vector<16x1xf32>
    %33 = vector.broadcast %32 : vector<16x1xf32> to vector<16x32xf32>
    %34 = arith.mulf %29, %33 : vector<16x32xf32>
    %35 = vector.broadcast %7 : vector<1x32xf32> to vector<16x32xf32>
    %36 = arith.mulf %34, %35 : vector<16x32xf32>
    %37 = vector.broadcast %8 : vector<1x32xf32> to vector<16x32xf32>
    %38 = arith.addf %36, %37 : vector<16x32xf32>
    %cst_13 = arith.constant dense<0.000000e+00> : vector<16x96xf32>
    %39 = tpu.matmul %38, %15, %cst_13 {dimension_numbers = #tpu.dot_dimension_numbers<[1], [0], [0], [1], [0, 0, 1, 1], [], []>} : vector<16x32xf32>, vector<32x96xf32>, vector<16x96xf32> -> vector<16x96xf32>
    %40 = vector.broadcast %3 : vector<1x96xf32> to vector<16x96xf32>
    %41 = arith.addf %39, %40 : vector<16x96xf32>
    %42 = vector.extract_strided_slice %41 {offsets = [0, 0], sizes = [16, 32], strides = [1, 1]} : vector<16x96xf32> to vector<16x32xf32>
    %cst_14 = arith.constant 0.353553385 : f32
    %43 = vector.broadcast %cst_14 : f32 to vector<16x32xf32>
    %44 = arith.mulf %42, %43 : vector<16x32xf32>
    %45 = vector.extract_strided_slice %44 {offsets = [0, 0], sizes = [16, 8], strides = [1, 1]} : vector<16x32xf32> to vector<16x8xf32>
    %46 = vector.extract_strided_slice %44 {offsets = [0, 8], sizes = [16, 8], strides = [1, 1]} : vector<16x32xf32> to vector<16x8xf32>
    %47 = vector.extract_strided_slice %44 {offsets = [0, 16], sizes = [16, 8], strides = [1, 1]} : vector<16x32xf32> to vector<16x8xf32>
    %48 = vector.extract_strided_slice %44 {offsets = [0, 24], sizes = [16, 8], strides = [1, 1]} : vector<16x32xf32> to vector<16x8xf32>
    %49 = vector.shape_cast %45 : vector<16x8xf32> to vector<1x16x8xf32>
    %50 = vector.shape_cast %46 : vector<16x8xf32> to vector<1x16x8xf32>
    %51 = vector.shape_cast %47 : vector<16x8xf32> to vector<1x16x8xf32>
    %52 = vector.shape_cast %48 : vector<16x8xf32> to vector<1x16x8xf32>
    %53 = tpu.concatenate %49, %50, %51, %52 in 0 : vector<1x16x8xf32>, vector<1x16x8xf32>, vector<1x16x8xf32>, vector<1x16x8xf32> -> vector<4x16x8xf32>
    %54 = vector.extract_strided_slice %41 {offsets = [0, 32], sizes = [16, 32], strides = [1, 1]} : vector<16x96xf32> to vector<16x32xf32>
    %55 = vector.extract_strided_slice %54 {offsets = [0, 0], sizes = [16, 8], strides = [1, 1]} : vector<16x32xf32> to vector<16x8xf32>
    %56 = vector.extract_strided_slice %54 {offsets = [0, 8], sizes = [16, 8], strides = [1, 1]} : vector<16x32xf32> to vector<16x8xf32>
    %57 = vector.extract_strided_slice %54 {offsets = [0, 16], sizes = [16, 8], strides = [1, 1]} : vector<16x32xf32> to vector<16x8xf32>
    %58 = vector.extract_strided_slice %54 {offsets = [0, 24], sizes = [16, 8], strides = [1, 1]} : vector<16x32xf32> to vector<16x8xf32>
    %59 = vector.shape_cast %55 : vector<16x8xf32> to vector<1x16x8xf32>
    %60 = vector.shape_cast %56 : vector<16x8xf32> to vector<1x16x8xf32>
    %61 = vector.shape_cast %57 : vector<16x8xf32> to vector<1x16x8xf32>
    %62 = vector.shape_cast %58 : vector<16x8xf32> to vector<1x16x8xf32>
    %63 = tpu.concatenate %59, %60, %61, %62 in 0 : vector<1x16x8xf32>, vector<1x16x8xf32>, vector<1x16x8xf32>, vector<1x16x8xf32> -> vector<4x16x8xf32>
    %64 = vector.extract_strided_slice %41 {offsets = [0, 64], sizes = [16, 32], strides = [1, 1]} : vector<16x96xf32> to vector<16x32xf32>
    %65 = vector.extract_strided_slice %64 {offsets = [0, 0], sizes = [16, 8], strides = [1, 1]} : vector<16x32xf32> to vector<16x8xf32>
    %66 = vector.extract_strided_slice %64 {offsets = [0, 8], sizes = [16, 8], strides = [1, 1]} : vector<16x32xf32> to vector<16x8xf32>
    %67 = vector.extract_strided_slice %64 {offsets = [0, 16], sizes = [16, 8], strides = [1, 1]} : vector<16x32xf32> to vector<16x8xf32>
    %68 = vector.extract_strided_slice %64 {offsets = [0, 24], sizes = [16, 8], strides = [1, 1]} : vector<16x32xf32> to vector<16x8xf32>
    %69 = vector.shape_cast %65 : vector<16x8xf32> to vector<1x16x8xf32>
    %70 = vector.shape_cast %66 : vector<16x8xf32> to vector<1x16x8xf32>
    %71 = vector.shape_cast %67 : vector<16x8xf32> to vector<1x16x8xf32>
    %72 = vector.shape_cast %68 : vector<16x8xf32> to vector<1x16x8xf32>
    %73 = tpu.concatenate %69, %70, %71, %72 in 0 : vector<1x16x8xf32>, vector<1x16x8xf32>, vector<1x16x8xf32>, vector<1x16x8xf32> -> vector<4x16x8xf32>
    "tpu.trace_start"() <{level = 10 : i32, message = "hqd,hkd->hqk"}> : () -> ()
    %cst_15 = arith.constant dense<0.000000e+00> : vector<4x16x16xf32>
    %74 = tpu.matmul %53, %63, %cst_15 {dimension_numbers = #tpu.dot_dimension_numbers<[2], [2], [1], [1], [0, 0, 0, 1, 1, 1], [0], [0]>} : vector<4x16x8xf32>, vector<4x16x8xf32>, vector<4x16x16xf32> -> vector<4x16x16xf32>
    "tpu.trace_stop"() : () -> ()
    %75 = vector.shape_cast %1 : vector<16x16xf32> to vector<1x16x16xf32>
    %76 = vector.broadcast %75 : vector<1x16x16xf32> to vector<4x16x16xf32>
    %77 = arith.addf %74, %76 : vector<4x16x16xf32>
    %cst_16 = arith.constant dense<0xFF800000> : vector<4x16xf32>
    %78 = vector.multi_reduction <maximumf>, %77, %cst_16 [2] : vector<4x16x16xf32> to vector<4x16xf32>
    %cst_17 = arith.constant 0xFF800000 : f32
    %79 = vector.broadcast %cst_17 : f32 to vector<4x16xf32>
    %80 = arith.maximumf %79, %78 : vector<4x16xf32>
    %81 = vector.shape_cast %80 : vector<4x16xf32> to vector<4x16x1xf32>
    %82 = vector.broadcast %81 : vector<4x16x1xf32> to vector<4x16x16xf32>
    %83 = arith.subf %77, %82 : vector<4x16x16xf32>
    %84 = math.exp %83 : vector<4x16x16xf32>
    %cst_18 = arith.constant dense<0.000000e+00> : vector<4x16xf32>
    %85 = vector.multi_reduction <add>, %84, %cst_18 [2] : vector<4x16x16xf32> to vector<4x16xf32>
    %86 = vector.shape_cast %85 : vector<4x16xf32> to vector<4x16x1xf32>
    %87 = vector.broadcast %86 : vector<4x16x1xf32> to vector<4x16x16xf32>
    %88 = arith.divf %84, %87 : vector<4x16x16xf32>
    "tpu.trace_start"() <{level = 10 : i32, message = "hqk,hkd->hqd"}> : () -> ()
    %cst_19 = arith.constant dense<0.000000e+00> : vector<4x16x8xf32>
    %89 = tpu.matmul %88, %73, %cst_19 {dimension_numbers = #tpu.dot_dimension_numbers<[2], [1], [1], [2], [0, 0, 0, 1, 1, 2], [0], [0]>} : vector<4x16x16xf32>, vector<4x16x8xf32>, vector<4x16x8xf32> -> vector<4x16x8xf32>
    "tpu.trace_stop"() : () -> ()
    %90 = vector.extract_strided_slice %89 {offsets = [0, 0, 0], sizes = [1, 16, 8], strides = [1, 1, 1]} : vector<4x16x8xf32> to vector<1x16x8xf32>
    %91 = vector.shape_cast %90 : vector<1x16x8xf32> to vector<16x8xf32>
    %92 = vector.extract_strided_slice %89 {offsets = [1, 0, 0], sizes = [1, 16, 8], strides = [1, 1, 1]} : vector<4x16x8xf32> to vector<1x16x8xf32>
    %93 = vector.shape_cast %92 : vector<1x16x8xf32> to vector<16x8xf32>
    %94 = vector.extract_strided_slice %89 {offsets = [2, 0, 0], sizes = [1, 16, 8], strides = [1, 1, 1]} : vector<4x16x8xf32> to vector<1x16x8xf32>
    %95 = vector.shape_cast %94 : vector<1x16x8xf32> to vector<16x8xf32>
    %96 = vector.extract_strided_slice %89 {offsets = [3, 0, 0], sizes = [1, 16, 8], strides = [1, 1, 1]} : vector<4x16x8xf32> to vector<1x16x8xf32>
    %97 = vector.shape_cast %96 : vector<1x16x8xf32> to vector<16x8xf32>
    %98 = tpu.concatenate %91, %93, %95, %97 in 1 : vector<16x8xf32>, vector<16x8xf32>, vector<16x8xf32>, vector<16x8xf32> -> vector<16x32xf32>
    %cst_20 = arith.constant dense<0.000000e+00> : vector<16x32xf32>
    %99 = tpu.matmul %98, %16, %cst_20 {dimension_numbers = #tpu.dot_dimension_numbers<[1], [0], [0], [1], [0, 0, 1, 1], [], []>} : vector<16x32xf32>, vector<32x32xf32>, vector<16x32xf32> -> vector<16x32xf32>
    %100 = vector.broadcast %5 : vector<1x32xf32> to vector<16x32xf32>
    %101 = arith.addf %99, %100 : vector<16x32xf32>
    %102 = arith.addf %0, %101 : vector<16x32xf32>
    %c0_21 = arith.constant 0 : index
    %c0_22 = arith.constant 0 : index
    %103 = vector.load %arg5[%c0_21, %c0_22] : memref<32x96xf32, #tpu.memory_space<vmem>>, vector<32x96xf32>
    %c0_23 = arith.constant 0 : index
    %c0_24 = arith.constant 0 : index
    %104 = vector.load %arg6[%c0_23, %c0_24] : memref<32x32xf32, #tpu.memory_space<vmem>>, vector<32x32xf32>
    %cst_25 = arith.constant dense<0.000000e+00> : vector<16xf32>
    %105 = vector.multi_reduction <add>, %102, %cst_25 [1] : vector<16x32xf32> to vector<16xf32>
    %106 = vector.shape_cast %105 : vector<16xf32> to vector<16x1xf32>
    %cst_26 = arith.constant 3.200000e+01 : f32
    %107 = vector.broadcast %cst_26 : f32 to vector<16x1xf32>
    %108 = arith.divf %106, %107 : vector<16x1xf32>
    %109 = vector.broadcast %108 : vector<16x1xf32> to vector<16x32xf32>
    %110 = arith.subf %102, %109 : vector<16x32xf32>
    %111 = arith.mulf %110, %110 : vector<16x32xf32>
    %cst_27 = arith.constant dense<0.000000e+00> : vector<16xf32>
    %112 = vector.multi_reduction <add>, %111, %cst_27 [1] : vector<16x32xf32> to vector<16xf32>
    %113 = vector.shape_cast %112 : vector<16xf32> to vector<16x1xf32>
    %cst_28 = arith.constant 3.200000e+01 : f32
    %114 = vector.broadcast %cst_28 : f32 to vector<16x1xf32>
    %115 = arith.divf %113, %114 : vector<16x1xf32>
    %116 = vector.broadcast %108 : vector<16x1xf32> to vector<16x32xf32>
    %117 = arith.subf %102, %116 : vector<16x32xf32>
    %cst_29 = arith.constant 9.99999974E-6 : f32
    %118 = vector.broadcast %cst_29 : f32 to vector<16x1xf32>
    %119 = arith.addf %115, %118 : vector<16x1xf32>
    %120 = math.rsqrt %119 : vector<16x1xf32>
    %121 = vector.broadcast %120 : vector<16x1xf32> to vector<16x32xf32>
    %122 = arith.mulf %117, %121 : vector<16x32xf32>
    %123 = vector.broadcast %9 : vector<1x32xf32> to vector<16x32xf32>
    %124 = arith.mulf %122, %123 : vector<16x32xf32>
    %125 = vector.broadcast %10 : vector<1x32xf32> to vector<16x32xf32>
    %126 = arith.addf %124, %125 : vector<16x32xf32>
    %cst_30 = arith.constant dense<0.000000e+00> : vector<16x96xf32>
    %127 = tpu.matmul %126, %103, %cst_30 {dimension_numbers = #tpu.dot_dimension_numbers<[1], [0], [0], [1], [0, 0, 1, 1], [], []>} : vector<16x32xf32>, vector<32x96xf32>, vector<16x96xf32> -> vector<16x96xf32>
    %128 = vector.broadcast %4 : vector<1x96xf32> to vector<16x96xf32>
    %129 = arith.addf %127, %128 : vector<16x96xf32>
    %130 = vector.extract_strided_slice %129 {offsets = [0, 0], sizes = [16, 32], strides = [1, 1]} : vector<16x96xf32> to vector<16x32xf32>
    %cst_31 = arith.constant 0.353553385 : f32
    %131 = vector.broadcast %cst_31 : f32 to vector<16x32xf32>
    %132 = arith.mulf %130, %131 : vector<16x32xf32>
    %133 = vector.extract_strided_slice %132 {offsets = [0, 0], sizes = [16, 8], strides = [1, 1]} : vector<16x32xf32> to vector<16x8xf32>
    %134 = vector.extract_strided_slice %132 {offsets = [0, 8], sizes = [16, 8], strides = [1, 1]} : vector<16x32xf32> to vector<16x8xf32>
    %135 = vector.extract_strided_slice %132 {offsets = [0, 16], sizes = [16, 8], strides = [1, 1]} : vector<16x32xf32> to vector<16x8xf32>
    %136 = vector.extract_strided_slice %132 {offsets = [0, 24], sizes = [16, 8], strides = [1, 1]} : vector<16x32xf32> to vector<16x8xf32>
    %137 = vector.shape_cast %133 : vector<16x8xf32> to vector<1x16x8xf32>
    %138 = vector.shape_cast %134 : vector<16x8xf32> to vector<1x16x8xf32>
    %139 = vector.shape_cast %135 : vector<16x8xf32> to vector<1x16x8xf32>
    %140 = vector.shape_cast %136 : vector<16x8xf32> to vector<1x16x8xf32>
    %141 = tpu.concatenate %137, %138, %139, %140 in 0 : vector<1x16x8xf32>, vector<1x16x8xf32>, vector<1x16x8xf32>, vector<1x16x8xf32> -> vector<4x16x8xf32>
    %142 = vector.extract_strided_slice %129 {offsets = [0, 32], sizes = [16, 32], strides = [1, 1]} : vector<16x96xf32> to vector<16x32xf32>
    %143 = vector.extract_strided_slice %142 {offsets = [0, 0], sizes = [16, 8], strides = [1, 1]} : vector<16x32xf32> to vector<16x8xf32>
    %144 = vector.extract_strided_slice %142 {offsets = [0, 8], sizes = [16, 8], strides = [1, 1]} : vector<16x32xf32> to vector<16x8xf32>
    %145 = vector.extract_strided_slice %142 {offsets = [0, 16], sizes = [16, 8], strides = [1, 1]} : vector<16x32xf32> to vector<16x8xf32>
    %146 = vector.extract_strided_slice %142 {offsets = [0, 24], sizes = [16, 8], strides = [1, 1]} : vector<16x32xf32> to vector<16x8xf32>
    %147 = vector.shape_cast %143 : vector<16x8xf32> to vector<1x16x8xf32>
    %148 = vector.shape_cast %144 : vector<16x8xf32> to vector<1x16x8xf32>
    %149 = vector.shape_cast %145 : vector<16x8xf32> to vector<1x16x8xf32>
    %150 = vector.shape_cast %146 : vector<16x8xf32> to vector<1x16x8xf32>
    %151 = tpu.concatenate %147, %148, %149, %150 in 0 : vector<1x16x8xf32>, vector<1x16x8xf32>, vector<1x16x8xf32>, vector<1x16x8xf32> -> vector<4x16x8xf32>
    %152 = vector.extract_strided_slice %129 {offsets = [0, 64], sizes = [16, 32], strides = [1, 1]} : vector<16x96xf32> to vector<16x32xf32>
    %153 = vector.extract_strided_slice %152 {offsets = [0, 0], sizes = [16, 8], strides = [1, 1]} : vector<16x32xf32> to vector<16x8xf32>
    %154 = vector.extract_strided_slice %152 {offsets = [0, 8], sizes = [16, 8], strides = [1, 1]} : vector<16x32xf32> to vector<16x8xf32>
    %155 = vector.extract_strided_slice %152 {offsets = [0, 16], sizes = [16, 8], strides = [1, 1]} : vector<16x32xf32> to vector<16x8xf32>
    %156 = vector.extract_strided_slice %152 {offsets = [0, 24], sizes = [16, 8], strides = [1, 1]} : vector<16x32xf32> to vector<16x8xf32>
    %157 = vector.shape_cast %153 : vector<16x8xf32> to vector<1x16x8xf32>
    %158 = vector.shape_cast %154 : vector<16x8xf32> to vector<1x16x8xf32>
    %159 = vector.shape_cast %155 : vector<16x8xf32> to vector<1x16x8xf32>
    %160 = vector.shape_cast %156 : vector<16x8xf32> to vector<1x16x8xf32>
    %161 = tpu.concatenate %157, %158, %159, %160 in 0 : vector<1x16x8xf32>, vector<1x16x8xf32>, vector<1x16x8xf32>, vector<1x16x8xf32> -> vector<4x16x8xf32>
    "tpu.trace_start"() <{level = 10 : i32, message = "hqd,hkd->hqk"}> : () -> ()
    %cst_32 = arith.constant dense<0.000000e+00> : vector<4x16x16xf32>
    %162 = tpu.matmul %141, %151, %cst_32 {dimension_numbers = #tpu.dot_dimension_numbers<[2], [2], [1], [1], [0, 0, 0, 1, 1, 1], [0], [0]>} : vector<4x16x8xf32>, vector<4x16x8xf32>, vector<4x16x16xf32> -> vector<4x16x16xf32>
    "tpu.trace_stop"() : () -> ()
    %163 = vector.shape_cast %1 : vector<16x16xf32> to vector<1x16x16xf32>
    %164 = vector.broadcast %163 : vector<1x16x16xf32> to vector<4x16x16xf32>
    %165 = arith.addf %162, %164 : vector<4x16x16xf32>
    %cst_33 = arith.constant dense<0xFF800000> : vector<4x16xf32>
    %166 = vector.multi_reduction <maximumf>, %165, %cst_33 [2] : vector<4x16x16xf32> to vector<4x16xf32>
    %cst_34 = arith.constant 0xFF800000 : f32
    %167 = vector.broadcast %cst_34 : f32 to vector<4x16xf32>
    %168 = arith.maximumf %167, %166 : vector<4x16xf32>
    %169 = vector.shape_cast %168 : vector<4x16xf32> to vector<4x16x1xf32>
    %170 = vector.broadcast %169 : vector<4x16x1xf32> to vector<4x16x16xf32>
    %171 = arith.subf %165, %170 : vector<4x16x16xf32>
    %172 = math.exp %171 : vector<4x16x16xf32>
    %cst_35 = arith.constant dense<0.000000e+00> : vector<4x16xf32>
    %173 = vector.multi_reduction <add>, %172, %cst_35 [2] : vector<4x16x16xf32> to vector<4x16xf32>
    %174 = vector.shape_cast %173 : vector<4x16xf32> to vector<4x16x1xf32>
    %175 = vector.broadcast %174 : vector<4x16x1xf32> to vector<4x16x16xf32>
    %176 = arith.divf %172, %175 : vector<4x16x16xf32>
    "tpu.trace_start"() <{level = 10 : i32, message = "hqk,hkd->hqd"}> : () -> ()
    %cst_36 = arith.constant dense<0.000000e+00> : vector<4x16x8xf32>
    %177 = tpu.matmul %176, %161, %cst_36 {dimension_numbers = #tpu.dot_dimension_numbers<[2], [1], [1], [2], [0, 0, 0, 1, 1, 2], [0], [0]>} : vector<4x16x16xf32>, vector<4x16x8xf32>, vector<4x16x8xf32> -> vector<4x16x8xf32>
    "tpu.trace_stop"() : () -> ()
    %178 = vector.extract_strided_slice %177 {offsets = [0, 0, 0], sizes = [1, 16, 8], strides = [1, 1, 1]} : vector<4x16x8xf32> to vector<1x16x8xf32>
    %179 = vector.shape_cast %178 : vector<1x16x8xf32> to vector<16x8xf32>
    %180 = vector.extract_strided_slice %177 {offsets = [1, 0, 0], sizes = [1, 16, 8], strides = [1, 1, 1]} : vector<4x16x8xf32> to vector<1x16x8xf32>
    %181 = vector.shape_cast %180 : vector<1x16x8xf32> to vector<16x8xf32>
    %182 = vector.extract_strided_slice %177 {offsets = [2, 0, 0], sizes = [1, 16, 8], strides = [1, 1, 1]} : vector<4x16x8xf32> to vector<1x16x8xf32>
    %183 = vector.shape_cast %182 : vector<1x16x8xf32> to vector<16x8xf32>
    %184 = vector.extract_strided_slice %177 {offsets = [3, 0, 0], sizes = [1, 16, 8], strides = [1, 1, 1]} : vector<4x16x8xf32> to vector<1x16x8xf32>
    %185 = vector.shape_cast %184 : vector<1x16x8xf32> to vector<16x8xf32>
    %186 = tpu.concatenate %179, %181, %183, %185 in 1 : vector<16x8xf32>, vector<16x8xf32>, vector<16x8xf32>, vector<16x8xf32> -> vector<16x32xf32>
    %cst_37 = arith.constant dense<0.000000e+00> : vector<16x32xf32>
    %187 = tpu.matmul %186, %104, %cst_37 {dimension_numbers = #tpu.dot_dimension_numbers<[1], [0], [0], [1], [0, 0, 1, 1], [], []>} : vector<16x32xf32>, vector<32x32xf32>, vector<16x32xf32> -> vector<16x32xf32>
    %188 = vector.broadcast %6 : vector<1x32xf32> to vector<16x32xf32>
    %189 = arith.addf %187, %188 : vector<16x32xf32>
    %190 = arith.addf %102, %189 : vector<16x32xf32>
    %cst_38 = arith.constant dense<0.000000e+00> : vector<16xf32>
    %191 = vector.multi_reduction <add>, %190, %cst_38 [1] : vector<16x32xf32> to vector<16xf32>
    %192 = vector.shape_cast %191 : vector<16xf32> to vector<16x1xf32>
    %cst_39 = arith.constant 3.200000e+01 : f32
    %193 = vector.broadcast %cst_39 : f32 to vector<16x1xf32>
    %194 = arith.divf %192, %193 : vector<16x1xf32>
    %195 = vector.broadcast %194 : vector<16x1xf32> to vector<16x32xf32>
    %196 = arith.subf %190, %195 : vector<16x32xf32>
    %197 = arith.mulf %196, %196 : vector<16x32xf32>
    %cst_40 = arith.constant dense<0.000000e+00> : vector<16xf32>
    %198 = vector.multi_reduction <add>, %197, %cst_40 [1] : vector<16x32xf32> to vector<16xf32>
    %199 = vector.shape_cast %198 : vector<16xf32> to vector<16x1xf32>
    %cst_41 = arith.constant 3.200000e+01 : f32
    %200 = vector.broadcast %cst_41 : f32 to vector<16x1xf32>
    %201 = arith.divf %199, %200 : vector<16x1xf32>
    %202 = vector.broadcast %194 : vector<16x1xf32> to vector<16x32xf32>
    %203 = arith.subf %190, %202 : vector<16x32xf32>
    %cst_42 = arith.constant 9.99999974E-6 : f32
    %204 = vector.broadcast %cst_42 : f32 to vector<16x1xf32>
    %205 = arith.addf %201, %204 : vector<16x1xf32>
    %206 = math.rsqrt %205 : vector<16x1xf32>
    %207 = vector.broadcast %206 : vector<16x1xf32> to vector<16x32xf32>
    %208 = arith.mulf %203, %207 : vector<16x32xf32>
    %209 = vector.broadcast %11 : vector<1x32xf32> to vector<16x32xf32>
    %210 = arith.mulf %208, %209 : vector<16x32xf32>
    %211 = vector.broadcast %12 : vector<1x32xf32> to vector<16x32xf32>
    %212 = arith.addf %210, %211 : vector<16x32xf32>
    %c0_43 = arith.constant 0 : index
    %c0_44 = arith.constant 0 : index
    %213 = vector.load %arg7[%c0_43, %c0_44] : memref<32x64xf32, #tpu.memory_space<vmem>>, vector<32x64xf32>
    %cst_45 = arith.constant dense<0.000000e+00> : vector<16x64xf32>
    %214 = tpu.matmul %212, %213, %cst_45 {dimension_numbers = #tpu.dot_dimension_numbers<[1], [0], [0], [1], [0, 0, 1, 1], [], []>} : vector<16x32xf32>, vector<32x64xf32>, vector<16x64xf32> -> vector<16x64xf32>
    %215 = vector.broadcast %13 : vector<1x64xf32> to vector<16x64xf32>
    %216 = arith.addf %214, %215 : vector<16x64xf32>
    %cst_46 = arith.constant 0.000000e+00 : f32
    %217 = vector.broadcast %cst_46 : f32 to vector<16x64xf32>
    %218 = arith.maximumf %216, %217 : vector<16x64xf32>
    %c0_47 = arith.constant 0 : index
    %c0_48 = arith.constant 0 : index
    %219 = vector.load %arg8[%c0_47, %c0_48] : memref<64x32xf32, #tpu.memory_space<vmem>>, vector<64x32xf32>
    %cst_49 = arith.constant dense<0.000000e+00> : vector<16x32xf32>
    %220 = tpu.matmul %218, %219, %cst_49 {dimension_numbers = #tpu.dot_dimension_numbers<[1], [0], [0], [1], [0, 0, 1, 1], [], []>} : vector<16x64xf32>, vector<64x32xf32>, vector<16x32xf32> -> vector<16x32xf32>
    %221 = vector.broadcast %14 : vector<1x32xf32> to vector<16x32xf32>
    %222 = arith.addf %220, %221 : vector<16x32xf32>
    %223 = arith.addf %190, %222 : vector<16x32xf32>
    %c0_50 = arith.constant 0 : index
    %c0_51 = arith.constant 0 : index
    %224 = vector.load %arg9[%c0_50, %c0_51] : memref<16x32xf32, #tpu.memory_space<vmem>>, vector<16x32xf32>
    tpu.vector_store %arg9[%c0_50, %c0_51], %223 {strides = array<i32>} : memref<16x32xf32, #tpu.memory_space<vmem>>, vector<16x32xf32>,
    return
  }
}

</mosaic_0001>

<bundles_post_ra>
// kernel: vertex_decoder_layer.1
= control target key start
LH: loop header
LB: loop body
LE: loop exit
PB: predicated region body
PF: predicated region fallthrough
CT: control target
= control target key end

     0   :  { %vm47_vm0 = vcmask 261120   ;;  %s3428_s0 = inlined_call_operand.vmem [shape: f32[16,32], index: 0, kind: input, shape index: {}]   ;;  %s3429_s1 = inlined_call_operand.vmem [shape: f32[16,16], index: 1, kind: input, shape index: {}]   ;;  %s3430_s2 = inlined_call_operand.vmem [shape: f32[12,96], index: 2, kind: input, shape index: {}]   ;;  %s3431_s3 = inlined_call_operand.vmem [shape: f32[32,96], index: 3, kind: input, shape index: {}]   ;;  %s3432_s4 = inlined_call_operand.vmem [shape: f32[32,32], index: 4, kind: input, shape index: {}]   ;;  %s3433_s5 = inlined_call_operand.vmem [shape: f32[32,96], index: 5, kind: input, shape index: {}]   ;;  %s3434_s6 = inlined_call_operand.vmem [shape: f32[32,32], index: 6, kind: input, shape index: {}]   ;;  %s3435_s7 = inlined_call_operand.vmem [shape: f32[32,64], index: 7, kind: input, shape index: {}]   ;;  %s3436_s8 = inlined_call_operand.vmem [shape: f32[64,32], index: 8, kind: input, shape index: {}]   ;;  %s3437_s9 = inlined_call_operand.hbm [shape: f32[16,32], index: 9, kind: output, shape index: {}]  }
   0x1   :  { %v2933_v0 = vld [vmem:[%s3428_s0] sm:$0xff]  ;;  %v2938_v1 = vld [vmem:[%s3428_s0 + $0x8] sm:$0xff] }
   0x2   :  { %14 = vsyncpa [#allocation3], 0  ;;  %v48_v2 = vsel %vm47_vm0, %v2933_v0, 0.0  ;;  %v51_v3 = vsel %vm47_vm0, %v2938_v1, 0.0  ;;  %v42_v14 = vld [vmem:[%s3431_s3 + $0x18] sm:$0xff]  ;;  %v41_v15 = vld [vmem:[%s3431_s3 + $0x10] sm:$0xff]  ;;  %v75_v23 = vlaneseq }
   0x3   :  { %49 = vadd.xlane.f32.xlu0 %v48_v2  ;;  %2575 = vmatprep.subr.mxu1 %v42_v14  ;;  %v40_v16 = vld [vmem:[%s3431_s3 + $0x8] sm:$0xff]  ;;  %v39_v17 = vld [vmem:[%s3431_s3] sm:$0xff]  ;;  %s2870_s3 = smov 112   ;;  %s2871_s22 = smov 120   ;;  %vm206_vm1 = vcmask 64512   ;;  %vm551_vm2 = vcmask 130048  }
   0x4   :  { %2576 = vmatpush3.msra.mxu1 %v42_v14  ;;  %v2960_v25 = vshrl.u32 %v75_v23, 7  ;;  %v2966_v27 = vld [vmem:[%s3430_s2] sm:$0xff]  ;;  %s2872_s23 = smov 96   ;;  %s2873_s24 = smov 104   ;;  %vm1016_vm3 = vcmask 195584   ;;  %vm2309_vm4 = vcmask 523264  }
   0x5   :  { %2577 = vmatprep.subr.mxu1 %v41_v15  ;;  %s2875_s15 = smov 8   ;;  %s2876_s16 = smov 16  }
   0x6   :  { %2578 = vmatpush3.msra.mxu1 %v41_v15  ;;  %v77_v26 = vsub.s32 4, %v2960_v25  ;;  %v83_v28 = vsub.s32 5, %v2960_v25  ;;  %v89_v39 = vsub.s32 0, %v2960_v25  ;;  %s2877_s17 = smov 24  }
   0x7   :  { %52 = vadd.xlane.f32.xlu0 %v51_v3  ;;  %2579 = vmatprep.subr.mxu1 %v40_v16 }
   0x8   :  { %2580 = vmatpush3.msra.mxu1 %v40_v16  ;;  %v78_v29 = vrot.slane %v2966_v27, %v77_v26  ;;  %v84_v32 = vrot.slane %v2966_v27, %v83_v28  ;;  %v90_v40 = vrot.slane %v2966_v27, %v89_v39 }
   0x9   :  { %2581 = vmatprep.subr.mxu1 %v39_v17 }
   0xa   :  { %2582 = vmatpush3.msra.mxu1 %v39_v17 }
  0x8c   :  { %v50_v4 = vpop.xlane.xlu0 %49 }
  0x8d   :  { %v55_v5 = vmul.f32 0.03125, %v50_v4 }
  0x8f   :  { %v57_v6 = vsub.f32 %v2933_v0, %v55_v5  ;;  %v3056_v5 = vld [vmem:[%s3429_s1 + $0x8] sm:$0xff] }
  0x90   :  { %v53_v7 = vpop.xlane.xlu0 %52 }
  0x91   :  { %v56_v8 = vmul.f32 0.03125, %v53_v7  ;;  %v59_v9 = vmul.f32 %v57_v6, %v57_v6  ;;  %v3061_v7 = vld [vmem:[%s3429_s1] sm:$0xff]  ;;  %s2874_s1 = smov 64  }
  0x93   :  { %v58_v10 = vsub.f32 %v2938_v1, %v56_v8  ;;  %v61_v11 = vsel %vm47_vm0, %v59_v9, 0.0 }
  0x94   :  { %62 = vadd.xlane.f32.xlu1 %v61_v11 }
  0x95   :  { %v60_v12 = vmul.f32 %v58_v10, %v58_v10 }
  0x97   :  { %v64_v13 = vsel %vm47_vm0, %v60_v12, 0.0 }
  0x98   :  { %65 = vadd.xlane.f32.xlu1 %v64_v13 }
 0x11d   :  { %v63_v18 = vpop.xlane.xlu1 %62 }
 0x11e   :  { %v67_v19 = vmul.f32 0.03125, %v63_v18 }
 0x120   :  { %v69_v20 = vadd.f32 1e-05, %v67_v19 }
 0x121   :  { %v66_v21 = vpop.xlane.xlu1 %65 }
 0x122   :  { %2771 = vrsqrt.f32 %v69_v20  ;;  %v68_v22 = vmul.f32 0.03125, %v66_v21 }
 0x124   :  { %v70_v24 = vadd.f32 1e-05, %v68_v22 }
 0x126   :  { %2773 = vrsqrt.f32 %v70_v24 }
 0x12f   :  { %v2772_v30 = vpop.eup %2771 }
 0x130   :  { %v73_v31 = vmul.f32 %v2772_v30, %v57_v6 }
 0x132   :  { %v79_v33 = vmul.f32 %v78_v29, %v73_v31 }
 0x133   :  { %v2774_v34 = vpop.eup %2773 }
 0x134   :  { %v74_v35 = vmul.f32 %v2774_v34, %v58_v10  ;;  %v85_v36 = vadd.f32 %v84_v32, %v79_v33 }
 0x136   :  { %v80_v37 = vmul.f32 %v78_v29, %v74_v35  ;;  %2583 = vmatprep.mubr.msk.f32.mxu1 %vm47_vm0, %v85_v36 }
 0x138   :  { %v86_v38 = vadd.f32 %v84_v32, %v80_v37 }
 0x13a   :  { %2584 = vmatmul.mubr.msk.f32.vlgmr.msra.gmra.mxu1 %vm47_vm0, %v86_v38 }
 0x1fa   :  { %v2585_v41 = vpop.f32.mrf.mxu1 }
 0x1fb   :  { %v2977_v42 = vadd.f32 %v2585_v41, %v90_v40 }
 0x1fc   :  { %v163_v43 = vpop.f32.mrf.mxu1 }
 0x1fd   :  { %v2979_v44 = vadd.f32 %v163_v43, %v90_v40  ;;  %196 = vrot.lane.b32.xlu1 %v2977_v42, %s2870_s3  ;;  %192 = vrot.lane.b32.xlu0 %v2977_v42, %s2871_s22  ;;  %v173_v46 = vmul.f32 0.35355338, %v2977_v42 }
 0x1ff   :  { %v172_v45 = vmul.f32 0.35355338, %v2979_v44 }
 0x201   :  { %194 = vrot.lane.b32.xlu0 %v2979_v44, %s2870_s3  ;;  %190 = vrot.lane.b32.xlu1 %v2979_v44, %s2871_s22 }
 0x202   :  { %2590 = vmatprep.mubr.msk.f32.mxu1 %vm206_vm1, %v172_v45 }
 0x205   :  { %204 = vrot.lane.b32.xlu0 %v2977_v42, %s2872_s23  ;;  %200 = vrot.lane.b32.xlu1 %v2977_v42, %s2873_s24 }
 0x209   :  { %202 = vrot.lane.b32.xlu0 %v2979_v44, %s2872_s23  ;;  %198 = vrot.lane.b32.xlu1 %v2979_v44, %s2873_s24 }
 0x20d   :  { %178 = vrot.lane.b32.xlu1 %v173_v46, %s2871_s22  ;;  %180 = vrot.lane.b32.xlu0 %v172_v45, %s2870_s3 }
 0x211   :  { %176 = vrot.lane.b32.xlu1 %v172_v45, %s2871_s22 }
 0x26f   :  { %v3003_v47 = vpop.permute.xlu1 %196  ;;  %v3005_v48 = vpop.permute.xlu0 %192 }
 0x270   :  { %379 = vrot.lane.b32.xlu0 %v3003_v47, %s2872_s23  ;;  %292 = vrot.lane.b32.xlu1 %v3005_v48, %s2872_s23 }
 0x273   :  { %v3011_v49 = vpop.permute.xlu0 %194  ;;  %v3013_v50 = vpop.permute.xlu1 %190 }
 0x274   :  { %290 = vrot.lane.b32.xlu1 %v3013_v50, %s2872_s23 }
 0x277   :  { %v205_v51 = vpop.permute.xlu0 %204  ;;  %v3017_v52 = vpop.permute.xlu1 %200 }
 0x278   :  { %2586 = vmatprep.subr.msk.mxu1 %vm206_vm1, %v205_v51  ;;  %466 = vrot.lane.b32.xlu0 %v3017_v52, %s2872_s23 }
 0x279   :  { %182 = vrot.lane.b32.xlu1 %v173_v46, %s2870_s3  ;;  %2587 = vmatpush3.xpose.msk.msra.mxu1 %vm206_vm1, %v205_v51 }
 0x27b   :  { %v203_v53 = vpop.permute.xlu0 %202  ;;  %v3024_v54 = vpop.permute.xlu1 %198 }
 0x27c   :  { %2588 = vmatprep.subr.msk.mxu1 %vm206_vm1, %v203_v53  ;;  %377 = vrot.lane.b32.xlu0 %v3011_v49, %s2872_s23 }
 0x27d   :  { %464 = vrot.lane.b32.xlu1 %v3024_v54, %s2872_s23  ;;  %2589 = vmatpush3.xpose.msk.msra.mxu1 %vm206_vm1, %v203_v53 }
 0x27f   :  { %v179_v55 = vpop.permute.xlu1 %178  ;;  %v181_v56 = vpop.permute.xlu0 %180 }
 0x280   :  { %184 = vrot.lane.b32.xlu0 %v172_v45, %s2873_s24  ;;  %2591 = vmatmul.mubr.msk.f32.vlgmr.msra.gmra.mxu1 %vm206_vm1, %v173_v46 }
 0x281   :  { %186 = vrot.lane.b32.xlu1 %v173_v46, %s2873_s24  ;;  %2604 = vmatprep.mubr.msk.f32.mxu1 %vm206_vm1, %v181_v56 }
 0x283   :  { %v177_v57 = vpop.permute.xlu1 %176 }
 0x284   :  { %2597 = vmatprep.mubr.msk.f32.mxu0 %vm206_vm1, %v177_v57 }
 0x2e2   :  { %v380_v58 = vpop.permute.xlu0 %379  ;;  %v293_v59 = vpop.permute.xlu1 %292 }
 0x2e3   :  { %2593 = vmatprep.subr.msk.mxu0 %vm206_vm1, %v293_v59  ;;  %2600 = vmatprep.subr.msk.mxu1 %vm206_vm1, %v380_v58 }
 0x2e4   :  { %2594 = vmatpush3.xpose.msk.msra.mxu0 %vm206_vm1, %v293_v59  ;;  %2601 = vmatpush3.xpose.msk.msra.mxu1 %vm206_vm1, %v380_v58 }
 0x2e6   :  { %v291_v60 = vpop.permute.xlu1 %290 }
 0x2e7   :  { %2595 = vmatprep.subr.msk.mxu0 %vm206_vm1, %v291_v60 }
 0x2e8   :  { %2596 = vmatpush3.xpose.msk.msra.mxu0 %vm206_vm1, %v291_v60 }
 0x2ea   :  { %v467_v61 = vpop.permute.xlu0 %466 }
 0x2eb   :  { %v183_v62 = vpop.permute.xlu1 %182  ;;  %2598 = vmatmul.mubr.msk.f32.vlgmr.msra.gmra.mxu0 %vm206_vm1, %v179_v55  ;;  %2607 = vmatprep.subr.msk.mxu0 %vm206_vm1, %v467_v61 }
 0x2ec   :  { %2608 = vmatpush3.xpose.msk.msra.mxu0 %vm206_vm1, %v467_v61 }
 0x2ee   :  { %v378_v63 = vpop.permute.xlu0 %377 }
 0x2ef   :  { %v465_v2 = vpop.permute.xlu1 %464  ;;  %2602 = vmatprep.subr.msk.mxu1 %vm206_vm1, %v378_v63 }
 0x2f0   :  { %2609 = vmatprep.subr.msk.mxu0 %vm206_vm1, %v465_v2  ;;  %2603 = vmatpush3.xpose.msk.msra.mxu1 %vm206_vm1, %v378_v63 }
 0x2f1   :  { %2610 = vmatpush3.xpose.msk.msra.mxu0 %vm206_vm1, %v465_v2 }
 0x2f2   :  { %v185_v3 = vpop.permute.xlu0 %184 }
 0x2f3   :  { %v187_v4 = vpop.permute.xlu1 %186  ;;  %2605 = vmatmul.mubr.msk.f32.vlgmr.msra.gmra.mxu1 %vm206_vm1, %v183_v62  ;;  %2611 = vmatprep.mubr.msk.f32.mxu0 %vm206_vm1, %v185_v3 }
 0x2f4   :  { %2612 = vmatmul.mubr.msk.f32.vlgmr.msra.gmra.mxu0 %vm206_vm1, %v187_v4 }
 0x340   :  { %v2592_v6 = vpop.f32.mrf.mxu1 }
 0x341   :  { %v287_v8 = vadd.f32 %v2592_v6, %v3056_v5 }
 0x342   :  { %v281_v9 = vpop.f32.mrf.mxu1 }
 0x343   :  { %v282_v10 = vadd.f32 %v281_v9, %v3061_v7  ;;  %v555_v11 = vsel %vm551_vm2, %v287_v8, -inf }
 0x344   :  { %556 = vmax.xlane.f32.xlu1 %v555_v11 }
 0x345   :  { %v552_v12 = vsel %vm551_vm2, %v282_v10, -inf }
 0x346   :  { %553 = vmax.xlane.f32.xlu0 %v552_v12 }
 0x3ab   :  { %v2599_v13 = vpop.f32.mrf.mxu0 }
 0x3ac   :  { %v374_v14 = vadd.f32 %v2599_v13, %v3056_v5 }
 0x3ad   :  { %v368_v15 = vpop.f32.mrf.mxu0 }
 0x3ae   :  { %v369_v16 = vadd.f32 %v368_v15, %v3061_v7  ;;  %v561_v17 = vsel %vm551_vm2, %v374_v14, -inf }
 0x3af   :  { %562 = vmax.xlane.f32.xlu0 %v561_v17 }
 0x3b0   :  { %v558_v18 = vsel %vm551_vm2, %v369_v16, -inf }
 0x3b3   :  { %v2606_v19 = vpop.f32.mrf.mxu1  ;;  %559 = vmax.xlane.f32.xlu0 %v558_v18 }
 0x3b4   :  { %v461_v20 = vadd.f32 %v2606_v19, %v3056_v5  ;;  %v2613_v21 = vpop.f32.mrf.mxu0 }
 0x3b5   :  { %v455_v22 = vpop.f32.mrf.mxu1  ;;  %v548_v23 = vadd.f32 %v2613_v21, %v3056_v5 }
 0x3b6   :  { %v456_v24 = vadd.f32 %v455_v22, %v3061_v7  ;;  %v542_v26 = vpop.f32.mrf.mxu0  ;;  %v567_v28 = vsel %vm551_vm2, %v461_v20, -inf }
 0x3b7   :  { %568 = vmax.xlane.f32.xlu1 %v567_v28  ;;  %v543_v29 = vadd.f32 %v542_v26, %v3061_v7  ;;  %v573_v31 = vsel %vm551_vm2, %v548_v23, -inf }
 0x3b8   :  { %v564_v30 = vsel %vm551_vm2, %v456_v24, -inf }
 0x3b9   :  { %565 = vmax.xlane.f32.xlu0 %v564_v30  ;;  %v570_v32 = vsel %vm551_vm2, %v543_v29, -inf }
 0x3bb   :  { %574 = vmax.xlane.f32.xlu1 %v573_v31 }
 0x3bd   :  { %571 = vmax.xlane.f32.xlu0 %v570_v32 }
 0x3cc   :  { %640 = vrot.lane.b32.xlu1 %v2979_v44, %s2874_s1 }
 0x3cd   :  { %v557_v35 = vpop.xlane.xlu1 %556 }
 0x3ce   :  { %v577_v37 = vsub.f32 %v287_v8, %v557_v35 }
 0x3cf   :  { %v554_v33 = vpop.xlane.xlu0 %553 }
 0x3d0   :  { %729 = vrot.lane.b32.xlu1 %v3005_v48, %s2874_s1  ;;  %v576_v34 = vsub.f32 %v282_v10, %v554_v33  ;;  %v586_v38 = vmul.f32 1.442695, %v577_v37 }
 0x3d2   :  { %v584_v36 = vmul.f32 1.442695, %v576_v34 }
 0x3d3   :  { %642 = vrot.lane.b32.xlu0 %v2977_v42, %s2874_s1 }
 0x3d4   :  { %727 = vrot.lane.b32.xlu1 %v3013_v50, %s2874_s1  ;;  %2775 = vpow2.f32 %v584_v36 }
 0x3d5   :  { %2777 = vpow2.f32 %v586_v38 }
 0x3d7   :  { %816 = vrot.lane.b32.xlu0 %v3003_v47, %s2874_s1 }
 0x3d8   :  { %903 = vrot.lane.b32.xlu1 %v3017_v52, %s2874_s1 }
 0x3e1   :  { %v3091_v40 = vpop.eup %2775 }
 0x3e2   :  { %v600_v41 = vsel %vm551_vm2, %v3091_v40, 0.0  ;;  %v3095_v42 = vpop.eup %2777 }
 0x3e3   :  { %v603_v43 = vsel %vm551_vm2, %v3095_v42, 0.0 }
 0x3f6   :  { %601 = vadd.xlane.f32.xlu0 %v600_v41 }
 0x3fc   :  { %604 = vadd.xlane.f32.xlu1 %v603_v43 }
 0x438   :  { %v563_v44 = vpop.xlane.xlu0 %562 }
 0x439   :  { %v579_v45 = vsub.f32 %v374_v14, %v563_v44 }
 0x43b   :  { %v590_v46 = vmul.f32 1.442695, %v579_v45 }
 0x43c   :  { %v560_v47 = vpop.xlane.xlu0 %559 }
 0x43d   :  { %2779 = vpow2.f32 %v590_v46  ;;  %v578_v48 = vsub.f32 %v369_v16, %v560_v47 }
 0x43f   :  { %v588_v50 = vmul.f32 1.442695, %v578_v48 }
 0x440   :  { %v569_v51 = vpop.xlane.xlu1 %568 }
 0x441   :  { %2781 = vpow2.f32 %v588_v50  ;;  %v581_v52 = vsub.f32 %v461_v20, %v569_v51  ;;  %v46_v51 = vld [vmem:[%s3432_s4 + $0x18] sm:$0xff] }
 0x442   :  { %v566_v53 = vpop.xlane.xlu0 %565 }
 0x443   :  { %v594_v55 = vmul.f32 1.442695, %v581_v52  ;;  %v580_v56 = vsub.f32 %v456_v24, %v566_v53  ;;  %v45_v52 = vld [vmem:[%s3432_s4 + $0x10] sm:$0xff] }
 0x444   :  { %v575_v57 = vpop.xlane.xlu1 %574 }
 0x445   :  { %2783 = vpow2.f32 %v594_v55  ;;  %v592_v58 = vmul.f32 1.442695, %v580_v56  ;;  %v583_v59 = vsub.f32 %v548_v23, %v575_v57  ;;  %v44_v55 = vld [vmem:[%s3432_s4 + $0x8] sm:$0xff]  ;;  %v43_v57 = vld [vmem:[%s3432_s4] sm:$0xff] }
 0x446   :  { %v572_v60 = vpop.xlane.xlu0 %571 }
 0x447   :  { %2785 = vpow2.f32 %v592_v58  ;;  %v598_v61 = vmul.f32 1.442695, %v583_v59  ;;  %v582_v62 = vsub.f32 %v543_v29, %v572_v60 }
 0x448   :  { %v641_v63 = vpop.permute.xlu1 %640 }
 0x449   :  { %2787 = vpow2.f32 %v598_v61  ;;  %v596_v2 = vmul.f32 1.442695, %v582_v62 }
 0x44a   :  { %v3099_v3 = vpop.eup %2779  ;;  %v643_v4 = vpop.permute.xlu0 %642 }
 0x44b   :  { %2789 = vpow2.f32 %v596_v2  ;;  %2614 = vmatprep.subr.mxu1 %v643_v4  ;;  %v609_v6 = vsel %vm551_vm2, %v3099_v3, 0.0 }
 0x44c   :  { %610 = vadd.xlane.f32.xlu1 %v609_v6  ;;  %2615 = vmatpush3.msra.mxu1 %v643_v4  ;;  %v730_v9 = vpop.permute.xlu1 %729 }
 0x44d   :  { %2616 = vmatprep.subr.mxu1 %v641_v63 }
 0x44e   :  { %v2782_v8 = vpop.eup %2781  ;;  %2617 = vmatpush3.msra.mxu1 %v641_v63  ;;  %v817_v10 = vpop.permute.xlu0 %816 }
 0x44f   :  { %2621 = vmatprep.subr.mxu1 %v730_v9  ;;  %2628 = vmatprep.subr.mxu0 %v817_v10  ;;  %v606_v11 = vsel %vm551_vm2, %v2782_v8, 0.0 }
 0x450   :  { %607 = vadd.xlane.f32.xlu0 %v606_v11  ;;  %2629 = vmatpush3.msra.mxu0 %v817_v10  ;;  %v728_v20 = vpop.permute.xlu1 %727 }
 0x452   :  { %v2784_v12 = vpop.eup %2783 }
 0x453   :  { %v615_v13 = vsel %vm551_vm2, %v2784_v12, 0.0 }
 0x454   :  { %v2786_v14 = vpop.eup %2785  ;;  %616 = vadd.xlane.f32.xlu1 %v615_v13  ;;  %v904_v22 = vpop.permute.xlu1 %903 }
 0x455   :  { %v612_v15 = vsel %vm551_vm2, %v2786_v14, 0.0 }
 0x456   :  { %v2788_v16 = vpop.eup %2787  ;;  %613 = vadd.xlane.f32.xlu0 %v612_v15  ;;  %v1021_v15 = vsub.s32 2, %v2960_v25 }
 0x457   :  { %v621_v17 = vsel %vm551_vm2, %v2788_v16, 0.0 }
 0x458   :  { %v2790_v18 = vpop.eup %2789  ;;  %622 = vadd.xlane.f32.xlu1 %v621_v17 }
 0x459   :  { %v618_v19 = vsel %vm551_vm2, %v2790_v18, 0.0 }
 0x45a   :  { %619 = vadd.xlane.f32.xlu0 %v618_v19 }
 0x469   :  { %901 = vrot.lane.b32.xlu1 %v3024_v54, %s2874_s1 }
 0x470   :  { %814 = vrot.lane.b32.xlu0 %v3011_v49, %s2874_s1 }
 0x47f   :  { %v602_v21 = vpop.xlane.xlu0 %601 }
 0x480   :  { %2791 = vrcp.f32 %v602_v21 }
 0x485   :  { %v605_v23 = vpop.xlane.xlu1 %604 }
 0x486   :  { %2793 = vrcp.f32 %v605_v23 }
 0x48d   :  { %v2792_v24 = vpop.eup %2791 }
 0x48e   :  { %v625_v26 = vmul.f32 %v2792_v24, %v3091_v40 }
 0x490   :  { %2618 = vmatprep.mubr.msk.f32.mxu1 %vm551_vm2, %v625_v26 }
 0x493   :  { %v2794_v28 = vpop.eup %2793 }
 0x494   :  { %v627_v29 = vmul.f32 %v2794_v28, %v3095_v42 }
 0x496   :  { %2619 = vmatmul.mubr.msk.f32.vlgmr.msra.gmra.mxu1 %vm551_vm2, %v627_v29 }
 0x497   :  { %2622 = vmatpush3.msra.mxu1 %v730_v9 }
 0x498   :  { %2623 = vmatprep.subr.mxu1 %v728_v20 }
 0x499   :  { %2624 = vmatpush3.msra.mxu1 %v728_v20 }
 0x49a   :  { %2635 = vmatprep.subr.mxu1 %v904_v22 }
 0x4d5   :  { %v611_v49 = vpop.xlane.xlu1 %610 }
 0x4d6   :  { %2795 = vrcp.f32 %v611_v49 }
 0x4d9   :  { %v608_v54 = vpop.xlane.xlu0 %607 }
 0x4da   :  { %2797 = vrcp.f32 %v608_v54 }
 0x4dd   :  { %v617_v30 = vpop.xlane.xlu1 %616 }
 0x4de   :  { %2799 = vrcp.f32 %v617_v30 }
 0x4df   :  { %v614_v31 = vpop.xlane.xlu0 %613 }
 0x4e0   :  { %2801 = vrcp.f32 %v614_v31 }
 0x4e1   :  { %v623_v32 = vpop.xlane.xlu1 %622 }
 0x4e2   :  { %2803 = vrcp.f32 %v623_v32 }
 0x4e3   :  { %v620_v33 = vpop.xlane.xlu0 %619  ;;  %v2796_v34 = vpop.eup %2795 }
 0x4e4   :  { %2805 = vrcp.f32 %v620_v33  ;;  %v631_v38 = vmul.f32 %v2796_v34, %v3099_v3  ;;  %v1109_v33 = vld [vmem:[%s3433_s5 + $0x18] sm:$0xff]  ;;  %v1108_v34 = vld [vmem:[%s3433_s5 + $0x10] sm:$0xff] }
 0x4e5   :  { %v902_v41 = vpop.permute.xlu1 %901 }
 0x4e7   :  { %v2798_v35 = vpop.eup %2797  ;;  %v815_v36 = vpop.permute.xlu0 %814 }
 0x4e8   :  { %2630 = vmatprep.subr.mxu0 %v815_v36  ;;  %v629_v37 = vmul.f32 %v2798_v35, %v2782_v8  ;;  %v1107_v35 = vld [vmem:[%s3433_s5 + $0x8] sm:$0xff] }
 0x4e9   :  { %2631 = vmatpush3.msra.mxu0 %v815_v36  ;;  %v1106_v36 = vld [vmem:[%s3433_s5] sm:$0xff] }
 0x4ea   :  { %2625 = vmatprep.mubr.msk.f32.mxu1 %vm551_vm2, %v629_v37  ;;  %2642 = vmatprep.subr.mxu0 %v46_v51 }
 0x4eb   :  { %2626 = vmatmul.mubr.msk.f32.vlgmr.msra.gmra.mxu1 %vm551_vm2, %v631_v38  ;;  %v2800_v40 = vpop.eup %2799 }
 0x4ec   :  { %2636 = vmatpush3.msra.mxu1 %v904_v22  ;;  %v635_v44 = vmul.f32 %v2800_v40, %v2784_v12 }
 0x4ed   :  { %v2802_v42 = vpop.eup %2801  ;;  %2637 = vmatprep.subr.mxu1 %v902_v41 }
 0x4ee   :  { %2638 = vmatpush3.msra.mxu1 %v902_v41  ;;  %v633_v43 = vmul.f32 %v2802_v42, %v2786_v14 }
 0x4ef   :  { %v2804_v45 = vpop.eup %2803  ;;  %2653 = vmatprep.subr.mxu1 %v1109_v33 }
 0x4f0   :  { %2632 = vmatprep.mubr.msk.f32.mxu0 %vm551_vm2, %v633_v43  ;;  %v639_v48 = vmul.f32 %v2804_v45, %v2788_v16  ;;  %v1022_v16 = vrot.slane %v2966_v27, %v1021_v15  ;;  %v1148_v45 = vsub.s32 7, %v2960_v25 }
 0x4f1   :  { %v2806_v46 = vpop.eup %2805  ;;  %2633 = vmatmul.mubr.msk.f32.vlgmr.msra.gmra.mxu0 %vm551_vm2, %v635_v44  ;;  %v1142_v44 = vsub.s32 6, %v2960_v25 }
 0x4f2   :  { %v637_v47 = vmul.f32 %v2806_v46, %v2790_v18  ;;  %2643 = vmatpush3.msra.mxu0 %v46_v51 }
 0x4f3   :  { %2644 = vmatprep.subr.mxu0 %v45_v52  ;;  %v1143_v46 = vrot.slane %v2966_v27, %v1142_v44 }
 0x4f4   :  { %2639 = vmatprep.mubr.msk.f32.mxu1 %vm551_vm2, %v637_v47  ;;  %2645 = vmatpush3.msra.mxu0 %v45_v52 }
 0x4f5   :  { %2640 = vmatmul.mubr.msk.f32.vlgmr.msra.gmra.mxu1 %vm551_vm2, %v639_v48  ;;  %2646 = vmatprep.subr.mxu0 %v44_v55 }
 0x4f6   :  { %2647 = vmatpush3.msra.mxu0 %v44_v55  ;;  %2654 = vmatpush3.msra.mxu1 %v1109_v33 }
 0x4f7   :  { %2648 = vmatprep.subr.mxu0 %v43_v57  ;;  %2655 = vmatprep.subr.mxu1 %v1108_v34 }
 0x4f8   :  { %2649 = vmatpush3.msra.mxu0 %v43_v57  ;;  %2656 = vmatpush3.msra.mxu1 %v1108_v34 }
 0x4f9   :  { %2657 = vmatprep.subr.mxu1 %v1107_v35 }
 0x4fa   :  { %2658 = vmatpush3.msra.mxu1 %v1107_v35 }
 0x4fb   :  { %2659 = vmatprep.subr.mxu1 %v1106_v36 }
 0x4fc   :  { %2660 = vmatpush3.msra.mxu1 %v1106_v36 }
 0x556   :  { %v2620_v50 = vpop.f32.mrf.mxu1 }
 0x558   :  { %v718_v53 = vpop.f32.mrf.mxu1 }
 0x5ab   :  { %v2627_v56 = vpop.f32.mrf.mxu1 }
 0x5ac   :  { %992 = vrot.lane.b32.xlu1 %v2627_v56, %s2875_s15 }
 0x5ad   :  { %v805_v58 = vpop.f32.mrf.mxu1 }
 0x5ae   :  { %990 = vrot.lane.b32.xlu0 %v805_v58, %s2875_s15  ;;  %v1154_v58 = vsub.s32 1, %v2960_v25 }
 0x5b1   :  { %v2634_v59 = vpop.f32.mrf.mxu0 }
 0x5b2   :  { %1000 = vrot.lane.b32.xlu1 %v2634_v59, %s2876_s16  ;;  %v1155_v59 = vrot.slane %v2966_v27, %v1154_v58 }
 0x5b3   :  { %v892_v60 = vpop.f32.mrf.mxu0 }
 0x5b4   :  { %998 = vrot.lane.b32.xlu0 %v892_v60, %s2876_s16 }
 0x5b5   :  { %v2641_v61 = vpop.f32.mrf.mxu1 }
 0x5b6   :  { %1008 = vrot.lane.b32.xlu1 %v2641_v61, %s2877_s17 }
 0x5b7   :  { %v979_v62 = vpop.f32.mrf.mxu1 }
 0x5b8   :  { %1006 = vrot.lane.b32.xlu0 %v979_v62, %s2877_s17 }
 0x61e   :  { %v993_v63 = vpop.permute.xlu1 %992 }
 0x61f   :  { %v1013_v9 = vsel %vm206_vm1, %v2620_v50, %v993_v63  ;;  %v1149_v50 = vrot.slane %v2966_v27, %v1148_v45 }
 0x620   :  { %v991_v2 = vpop.permute.xlu0 %990 }
 0x621   :  { %v1012_v6 = vsel %vm206_vm1, %v718_v53, %v991_v2 }
 0x624   :  { %v1001_v3 = vpop.permute.xlu1 %1000 }
 0x625   :  { %v1015_v12 = vsel %vm551_vm2, %v1013_v9, %v1001_v3 }
 0x626   :  { %v999_v4 = vpop.permute.xlu0 %998 }
 0x627   :  { %v1014_v10 = vsel %vm551_vm2, %v1012_v6, %v999_v4 }
 0x628   :  { %v1009_v8 = vpop.permute.xlu1 %1008 }
 0x629   :  { %v1018_v14 = vsel %vm1016_vm3, %v1015_v12, %v1009_v8 }
 0x62a   :  { %v1007_v11 = vpop.permute.xlu0 %1006 }
 0x62b   :  { %v1017_v13 = vsel %vm1016_vm3, %v1014_v10, %v1007_v11 }
 0x62c   :  { %2650 = vmatprep.mubr.msk.f32.mxu0 %vm47_vm0, %v1017_v13 }
 0x62d   :  { %2651 = vmatmul.mubr.msk.f32.vlgmr.msra.gmra.mxu0 %vm47_vm0, %v1018_v14 }
 0x6ed   :  { %v2652_v17 = vpop.f32.mrf.mxu0 }
 0x6ee   :  { %v1101_v18 = vadd.f32 %v2652_v17, %v1022_v16 }
 0x6ef   :  { %v1095_v19 = vpop.f32.mrf.mxu0 }
 0x6f0   :  { %v3154_v20 = vadd.f32 %v1101_v18, %v2938_v1  ;;  %v1096_v21 = vadd.f32 %v1095_v19, %v1022_v16 }
 0x6f2   :  { %v3157_v22 = vadd.f32 %v1096_v21, %v2933_v0  ;;  %v1117_v23 = vsel %vm47_vm0, %v3154_v20, 0.0 }
 0x6f3   :  { %1118 = vadd.xlane.f32.xlu1 %v1117_v23 }
 0x6f4   :  { %v1114_v24 = vsel %vm47_vm0, %v3157_v22, 0.0 }
 0x6f5   :  { %1115 = vadd.xlane.f32.xlu0 %v1114_v24 }
 0x77c   :  { %v1119_v26 = vpop.xlane.xlu1 %1118 }
 0x77d   :  { %v1121_v28 = vmul.f32 0.03125, %v1119_v26 }
 0x77e   :  { %v1116_v29 = vpop.xlane.xlu0 %1115 }
 0x77f   :  { %v1120_v49 = vmul.f32 0.03125, %v1116_v29  ;;  %v1123_v54 = vsub.f32 %v3154_v20, %v1121_v28 }
 0x781   :  { %v1122_v1 = vsub.f32 %v3157_v22, %v1120_v49  ;;  %v1125_v31 = vmul.f32 %v1123_v54, %v1123_v54 }
 0x783   :  { %v1124_v30 = vmul.f32 %v1122_v1, %v1122_v1  ;;  %v1129_v32 = vsel %vm47_vm0, %v1125_v31, 0.0 }
 0x785   :  { %v1126_v0 = vsel %vm47_vm0, %v1124_v30, 0.0 }
 0x786   :  { %1127 = vadd.xlane.f32.xlu0 %v1126_v0 }
 0x78a   :  { %1130 = vadd.xlane.f32.xlu0 %v1129_v32 }
 0x80f   :  { %v1128_v37 = vpop.xlane.xlu0 %1127 }
 0x810   :  { %v1132_v38 = vmul.f32 0.03125, %v1128_v37 }
 0x812   :  { %v1134_v40 = vadd.f32 1e-05, %v1132_v38 }
 0x813   :  { %v1131_v41 = vpop.xlane.xlu0 %1130 }
 0x814   :  { %2807 = vrsqrt.f32 %v1134_v40  ;;  %v1133_v42 = vmul.f32 0.03125, %v1131_v41 }
 0x816   :  { %v1135_v43 = vadd.f32 1e-05, %v1133_v42 }
 0x818   :  { %2809 = vrsqrt.f32 %v1135_v43 }
 0x821   :  { %v2808_v47 = vpop.eup %2807 }
 0x822   :  { %v1138_v48 = vmul.f32 %v2808_v47, %v1122_v1 }
 0x824   :  { %v1144_v51 = vmul.f32 %v1143_v46, %v1138_v48 }
 0x825   :  { %v2810_v52 = vpop.eup %2809 }
 0x826   :  { %v1139_v53 = vmul.f32 %v2810_v52, %v1123_v54  ;;  %v1150_v55 = vadd.f32 %v1149_v50, %v1144_v51 }
 0x828   :  { %v1145_v56 = vmul.f32 %v1143_v46, %v1139_v53  ;;  %2661 = vmatprep.mubr.msk.f32.mxu1 %vm47_vm0, %v1150_v55 }
 0x82a   :  { %v1151_v57 = vadd.f32 %v1149_v50, %v1145_v56 }
 0x82c   :  { %2662 = vmatmul.mubr.msk.f32.vlgmr.msra.gmra.mxu1 %vm47_vm0, %v1151_v57 }
 0x8ec   :  { %v2663_v60 = vpop.f32.mrf.mxu1 }
 0x8ed   :  { %v3189_v61 = vadd.f32 %v2663_v60, %v1155_v59 }
 0x8ee   :  { %v1228_v62 = vpop.f32.mrf.mxu1 }
 0x8ef   :  { %v3191_v63 = vadd.f32 %v1228_v62, %v1155_v59  ;;  %1261 = vrot.lane.b32.xlu1 %v3189_v61, %s2870_s3  ;;  %1257 = vrot.lane.b32.xlu0 %v3189_v61, %s2871_s22  ;;  %v1238_v27 = vmul.f32 0.35355338, %v3189_v61 }
 0x8f1   :  { %v1237_v2 = vmul.f32 0.35355338, %v3191_v63 }
 0x8f3   :  { %1259 = vrot.lane.b32.xlu0 %v3191_v63, %s2870_s3  ;;  %1255 = vrot.lane.b32.xlu1 %v3191_v63, %s2871_s22 }
 0x8f4   :  { %2668 = vmatprep.mubr.msk.f32.mxu0 %vm206_vm1, %v1237_v2 }
 0x8f7   :  { %1269 = vrot.lane.b32.xlu0 %v3189_v61, %s2872_s23  ;;  %1265 = vrot.lane.b32.xlu1 %v3189_v61, %s2873_s24 }
 0x8fb   :  { %1267 = vrot.lane.b32.xlu0 %v3191_v63, %s2872_s23  ;;  %1263 = vrot.lane.b32.xlu1 %v3191_v63, %s2873_s24 }
 0x8ff   :  { %1243 = vrot.lane.b32.xlu1 %v1238_v27, %s2871_s22  ;;  %1245 = vrot.lane.b32.xlu0 %v1237_v2, %s2870_s3 }
 0x903   :  { %1241 = vrot.lane.b32.xlu1 %v1237_v2, %s2871_s22 }
 0x961   :  { %v3215_v3 = vpop.permute.xlu1 %1261  ;;  %v3217_v4 = vpop.permute.xlu0 %1257 }
 0x962   :  { %1443 = vrot.lane.b32.xlu0 %v3215_v3, %s2872_s23  ;;  %1356 = vrot.lane.b32.xlu1 %v3217_v4, %s2872_s23 }
 0x965   :  { %v3223_v6 = vpop.permute.xlu0 %1259  ;;  %v3225_v8 = vpop.permute.xlu1 %1255 }
 0x966   :  { %1354 = vrot.lane.b32.xlu1 %v3225_v8, %s2872_s23 }
 0x969   :  { %v1270_v9 = vpop.permute.xlu0 %1269  ;;  %v3229_v10 = vpop.permute.xlu1 %1265 }
 0x96a   :  { %2664 = vmatprep.subr.msk.mxu0 %vm206_vm1, %v1270_v9  ;;  %1530 = vrot.lane.b32.xlu0 %v3229_v10, %s2872_s23 }
 0x96b   :  { %1247 = vrot.lane.b32.xlu1 %v1238_v27, %s2870_s3  ;;  %2665 = vmatpush3.xpose.msk.msra.mxu0 %vm206_vm1, %v1270_v9 }
 0x96d   :  { %v1268_v11 = vpop.permute.xlu0 %1267  ;;  %v3236_v12 = vpop.permute.xlu1 %1263 }
 0x96e   :  { %2666 = vmatprep.subr.msk.mxu0 %vm206_vm1, %v1268_v11  ;;  %1441 = vrot.lane.b32.xlu0 %v3223_v6, %s2872_s23 }
 0x96f   :  { %1528 = vrot.lane.b32.xlu1 %v3236_v12, %s2872_s23  ;;  %2667 = vmatpush3.xpose.msk.msra.mxu0 %vm206_vm1, %v1268_v11 }
 0x971   :  { %v1244_v13 = vpop.permute.xlu1 %1243  ;;  %v1246_v14 = vpop.permute.xlu0 %1245 }
 0x972   :  { %1249 = vrot.lane.b32.xlu0 %v1237_v2, %s2873_s24  ;;  %2669 = vmatmul.mubr.msk.f32.vlgmr.msra.gmra.mxu0 %vm206_vm1, %v1238_v27 }
 0x973   :  { %1251 = vrot.lane.b32.xlu1 %v1238_v27, %s2873_s24  ;;  %2682 = vmatprep.mubr.msk.f32.mxu0 %vm206_vm1, %v1246_v14 }
 0x975   :  { %v1242_v16 = vpop.permute.xlu1 %1241 }
 0x976   :  { %2675 = vmatprep.mubr.msk.f32.mxu1 %vm206_vm1, %v1242_v16 }
 0x9d4   :  { %v1444_v17 = vpop.permute.xlu0 %1443  ;;  %v1357_v18 = vpop.permute.xlu1 %1356 }
 0x9d5   :  { %2671 = vmatprep.subr.msk.mxu1 %vm206_vm1, %v1357_v18  ;;  %2678 = vmatprep.subr.msk.mxu0 %vm206_vm1, %v1444_v17 }
 0x9d6   :  { %2672 = vmatpush3.xpose.msk.msra.mxu1 %vm206_vm1, %v1357_v18  ;;  %2679 = vmatpush3.xpose.msk.msra.mxu0 %vm206_vm1, %v1444_v17 }
 0x9d8   :  { %v1355_v19 = vpop.permute.xlu1 %1354 }
 0x9d9   :  { %2673 = vmatprep.subr.msk.mxu1 %vm206_vm1, %v1355_v19 }
 0x9da   :  { %2674 = vmatpush3.xpose.msk.msra.mxu1 %vm206_vm1, %v1355_v19 }
 0x9dc   :  { %v1531_v21 = vpop.permute.xlu0 %1530 }
 0x9dd   :  { %v1248_v23 = vpop.permute.xlu1 %1247  ;;  %2676 = vmatmul.mubr.msk.f32.vlgmr.msra.gmra.mxu1 %vm206_vm1, %v1244_v13  ;;  %2685 = vmatprep.subr.msk.mxu1 %vm206_vm1, %v1531_v21 }
 0x9de   :  { %2686 = vmatpush3.xpose.msk.msra.mxu1 %vm206_vm1, %v1531_v21 }
 0x9e0   :  { %v1442_v24 = vpop.permute.xlu0 %1441 }
 0x9e1   :  { %v1529_v26 = vpop.permute.xlu1 %1528  ;;  %2680 = vmatprep.subr.msk.mxu0 %vm206_vm1, %v1442_v24 }
 0x9e2   :  { %2687 = vmatprep.subr.msk.mxu1 %vm206_vm1, %v1529_v26  ;;  %2681 = vmatpush3.xpose.msk.msra.mxu0 %vm206_vm1, %v1442_v24 }
 0x9e3   :  { %2688 = vmatpush3.xpose.msk.msra.mxu1 %vm206_vm1, %v1529_v26 }
 0x9e4   :  { %v1250_v28 = vpop.permute.xlu0 %1249 }
 0x9e5   :  { %v1252_v29 = vpop.permute.xlu1 %1251  ;;  %2683 = vmatmul.mubr.msk.f32.vlgmr.msra.gmra.mxu0 %vm206_vm1, %v1248_v23  ;;  %2689 = vmatprep.mubr.msk.f32.mxu1 %vm206_vm1, %v1250_v28 }
 0x9e6   :  { %2690 = vmatmul.mubr.msk.f32.vlgmr.msra.gmra.mxu1 %vm206_vm1, %v1252_v29 }
 0xa32   :  { %v2670_v49 = vpop.f32.mrf.mxu0 }
 0xa33   :  { %v1351_v54 = vadd.f32 %v2670_v49, %v3056_v5 }
 0xa34   :  { %v1345_v1 = vpop.f32.mrf.mxu0 }
 0xa35   :  { %v1346_v30 = vadd.f32 %v1345_v1, %v3061_v7  ;;  %v1618_v0 = vsel %vm551_vm2, %v1351_v54, -inf }
 0xa36   :  { %1619 = vmax.xlane.f32.xlu1 %v1618_v0 }
 0xa37   :  { %v1615_v31 = vsel %vm551_vm2, %v1346_v30, -inf }
 0xa38   :  { %1616 = vmax.xlane.f32.xlu0 %v1615_v31 }
 0xa9d   :  { %v2677_v32 = vpop.f32.mrf.mxu1 }
 0xa9e   :  { %v1438_v33 = vadd.f32 %v2677_v32, %v3056_v5 }
 0xa9f   :  { %v1432_v34 = vpop.f32.mrf.mxu1 }
 0xaa0   :  { %v1433_v35 = vadd.f32 %v1432_v34, %v3061_v7  ;;  %v1624_v36 = vsel %vm551_vm2, %v1438_v33, -inf }
 0xaa1   :  { %1625 = vmax.xlane.f32.xlu0 %v1624_v36 }
 0xaa2   :  { %v1621_v37 = vsel %vm551_vm2, %v1433_v35, -inf }
 0xaa5   :  { %v2684_v38 = vpop.f32.mrf.mxu0  ;;  %1622 = vmax.xlane.f32.xlu0 %v1621_v37 }
 0xaa6   :  { %v1525_v40 = vadd.f32 %v2684_v38, %v3056_v5  ;;  %v2691_v41 = vpop.f32.mrf.mxu1 }
 0xaa7   :  { %v1519_v42 = vpop.f32.mrf.mxu0  ;;  %v1612_v43 = vadd.f32 %v2691_v41, %v3056_v5 }
 0xaa8   :  { %v1520_v44 = vadd.f32 %v1519_v42, %v3061_v7  ;;  %v1606_v45 = vpop.f32.mrf.mxu1  ;;  %v1630_v46 = vsel %vm551_vm2, %v1525_v40, -inf }
 0xaa9   :  { %1631 = vmax.xlane.f32.xlu1 %v1630_v46  ;;  %v1607_v47 = vadd.f32 %v1606_v45, %v3061_v7  ;;  %v1636_v50 = vsel %vm551_vm2, %v1612_v43, -inf }
 0xaaa   :  { %v1627_v48 = vsel %vm551_vm2, %v1520_v44, -inf }
 0xaab   :  { %1628 = vmax.xlane.f32.xlu0 %v1627_v48  ;;  %v1633_v51 = vsel %vm551_vm2, %v1607_v47, -inf }
 0xaad   :  { %1637 = vmax.xlane.f32.xlu1 %v1636_v50 }
 0xaaf   :  { %1634 = vmax.xlane.f32.xlu0 %v1633_v51 }
 0xabe   :  { %1792 = vrot.lane.b32.xlu1 %v3217_v4, %s2874_s1 }
 0xabf   :  { %v1620_v52 = vpop.xlane.xlu1 %1619 }
 0xac0   :  { %v1640_v55 = vsub.f32 %v1351_v54, %v1620_v52 }
 0xac1   :  { %v1617_v5 = vpop.xlane.xlu0 %1616 }
 0xac2   :  { %1703 = vrot.lane.b32.xlu1 %v3191_v63, %s2874_s1  ;;  %v1639_v7 = vsub.f32 %v1346_v30, %v1617_v5  ;;  %v1649_v56 = vmul.f32 1.442695, %v1640_v55 }
 0xac4   :  { %v1647_v53 = vmul.f32 1.442695, %v1639_v7 }
 0xac5   :  { %1705 = vrot.lane.b32.xlu0 %v3189_v61, %s2874_s1 }
 0xac6   :  { %1790 = vrot.lane.b32.xlu1 %v3225_v8, %s2874_s1  ;;  %2811 = vpow2.f32 %v1647_v53 }
 0xac7   :  { %2813 = vpow2.f32 %v1649_v56 }
 0xac9   :  { %1879 = vrot.lane.b32.xlu0 %v3215_v3, %s2874_s1 }
 0xaca   :  { %1966 = vrot.lane.b32.xlu1 %v3229_v10, %s2874_s1 }
 0xad3   :  { %v3293_v57 = vpop.eup %2811 }
 0xad4   :  { %v1663_v59 = vsel %vm551_vm2, %v3293_v57, 0.0  ;;  %v3297_v60 = vpop.eup %2813 }
 0xad5   :  { %v1666_v61 = vsel %vm551_vm2, %v3297_v60, 0.0 }
 0xae8   :  { %1664 = vadd.xlane.f32.xlu0 %v1663_v59 }
 0xaee   :  { %1667 = vadd.xlane.f32.xlu1 %v1666_v61 }
 0xb2a   :  { %v1626_v62 = vpop.xlane.xlu0 %1625 }
 0xb2b   :  { %v1642_v63 = vsub.f32 %v1438_v33, %v1626_v62 }
 0xb2d   :  { %v1653_v2 = vmul.f32 1.442695, %v1642_v63 }
 0xb2e   :  { %v1623_v27 = vpop.xlane.xlu0 %1622 }
 0xb2f   :  { %2815 = vpow2.f32 %v1653_v2  ;;  %v1641_v3 = vsub.f32 %v1433_v35, %v1623_v27 }
 0xb31   :  { %v1651_v4 = vmul.f32 1.442695, %v1641_v3  ;;  %v1113_v3 = vld [vmem:[%s3434_s6 + $0x18] sm:$0xff] }
 0xb32   :  { %v1632_v8 = vpop.xlane.xlu1 %1631 }
 0xb33   :  { %2817 = vpow2.f32 %v1651_v4  ;;  %v1644_v9 = vsub.f32 %v1525_v40, %v1632_v8  ;;  %v1112_v4 = vld [vmem:[%s3434_s6 + $0x10] sm:$0xff]  ;;  %v1111_v8 = vld [vmem:[%s3434_s6 + $0x8] sm:$0xff] }
 0xb34   :  { %v1629_v10 = vpop.xlane.xlu0 %1628 }
 0xb35   :  { %v1657_v11 = vmul.f32 1.442695, %v1644_v9  ;;  %v1643_v13 = vsub.f32 %v1520_v44, %v1629_v10 }
 0xb36   :  { %v1638_v14 = vpop.xlane.xlu1 %1637 }
 0xb37   :  { %2819 = vpow2.f32 %v1657_v11  ;;  %v1655_v16 = vmul.f32 1.442695, %v1643_v13  ;;  %v1646_v17 = vsub.f32 %v1612_v43, %v1638_v14  ;;  %v1110_v11 = vld [vmem:[%s3434_s6] sm:$0xff] }
 0xb38   :  { %v1635_v18 = vpop.xlane.xlu0 %1634 }
 0xb39   :  { %2821 = vpow2.f32 %v1655_v16  ;;  %v1661_v19 = vmul.f32 1.442695, %v1646_v17  ;;  %v1645_v21 = vsub.f32 %v1607_v47, %v1635_v18 }
 0xb3a   :  { %v1793_v23 = vpop.permute.xlu1 %1792 }
 0xb3b   :  { %2823 = vpow2.f32 %v1661_v19  ;;  %v1659_v24 = vmul.f32 1.442695, %v1645_v21  ;;  %2699 = vmatprep.subr.mxu1 %v1793_v23 }
 0xb3c   :  { %v3301_v26 = vpop.eup %2815  ;;  %2700 = vmatpush3.msra.mxu1 %v1793_v23  ;;  %v1706_v28 = vpop.permute.xlu0 %1705 }
 0xb3d   :  { %2825 = vpow2.f32 %v1659_v24  ;;  %2692 = vmatprep.subr.mxu0 %v1706_v28  ;;  %v1672_v29 = vsel %vm551_vm2, %v3301_v26, 0.0 }
 0xb3e   :  { %v1704_v49 = vpop.permute.xlu1 %1703  ;;  %1673 = vadd.xlane.f32.xlu1 %v1672_v29  ;;  %2693 = vmatpush3.msra.mxu0 %v1706_v28 }
 0xb3f   :  { %2694 = vmatprep.subr.mxu0 %v1704_v49 }
 0xb40   :  { %v2818_v54 = vpop.eup %2817  ;;  %2695 = vmatpush3.msra.mxu0 %v1704_v49  ;;  %v1880_v1 = vpop.permute.xlu0 %1879 }
 0xb41   :  { %2706 = vmatprep.subr.mxu0 %v1880_v1  ;;  %v1669_v30 = vsel %vm551_vm2, %v2818_v54, 0.0 }
 0xb42   :  { %v1791_v0 = vpop.permute.xlu1 %1790  ;;  %1670 = vadd.xlane.f32.xlu0 %v1669_v30 }
 0xb43   :  { %2701 = vmatprep.subr.mxu1 %v1791_v0 }
 0xb44   :  { %v2820_v31 = vpop.eup %2819  ;;  %2702 = vmatpush3.msra.mxu1 %v1791_v0 }
 0xb45   :  { %v1678_v32 = vsel %vm551_vm2, %v2820_v31, 0.0 }
 0xb46   :  { %v2822_v33 = vpop.eup %2821  ;;  %v1967_v34 = vpop.permute.xlu1 %1966  ;;  %1679 = vadd.xlane.f32.xlu1 %v1678_v32  ;;  %v2083_v32 = vsub.s32 3, %v2960_v25 }
 0xb47   :  { %2713 = vmatprep.subr.mxu1 %v1967_v34  ;;  %v1675_v35 = vsel %vm551_vm2, %v2822_v33, 0.0 }
 0xb48   :  { %v2824_v36 = vpop.eup %2823  ;;  %1676 = vadd.xlane.f32.xlu0 %v1675_v35 }
 0xb49   :  { %v1684_v37 = vsel %vm551_vm2, %v2824_v36, 0.0 }
 0xb4a   :  { %v2826_v38 = vpop.eup %2825  ;;  %1685 = vadd.xlane.f32.xlu1 %v1684_v37 }
 0xb4b   :  { %v1681_v40 = vsel %vm551_vm2, %v2826_v38, 0.0 }
 0xb4c   :  { %1682 = vadd.xlane.f32.xlu0 %v1681_v40 }
 0xb5b   :  { %1964 = vrot.lane.b32.xlu1 %v3236_v12, %s2874_s1 }
 0xb62   :  { %1877 = vrot.lane.b32.xlu0 %v3223_v6, %s2874_s1 }
 0xb71   :  { %v1665_v41 = vpop.xlane.xlu0 %1664 }
 0xb72   :  { %2827 = vrcp.f32 %v1665_v41 }
 0xb77   :  { %v1668_v42 = vpop.xlane.xlu1 %1667 }
 0xb78   :  { %2829 = vrcp.f32 %v1668_v42 }
 0xb7f   :  { %v2828_v43 = vpop.eup %2827 }
 0xb80   :  { %v1688_v44 = vmul.f32 %v2828_v43, %v3293_v57 }
 0xb82   :  { %2696 = vmatprep.mubr.msk.f32.mxu0 %vm551_vm2, %v1688_v44 }
 0xb85   :  { %v2830_v45 = vpop.eup %2829 }
 0xb86   :  { %v1690_v46 = vmul.f32 %v2830_v45, %v3297_v60 }
 0xb88   :  { %2697 = vmatmul.mubr.msk.f32.vlgmr.msra.gmra.mxu0 %vm551_vm2, %v1690_v46 }
 0xb89   :  { %2707 = vmatpush3.msra.mxu0 %v1880_v1 }
 0xbc7   :  { %v1674_v47 = vpop.xlane.xlu1 %1673 }
 0xbc8   :  { %2831 = vrcp.f32 %v1674_v47 }
 0xbcb   :  { %v1671_v12 = vpop.xlane.xlu0 %1670 }
 0xbcc   :  { %2833 = vrcp.f32 %v1671_v12 }
 0xbcf   :  { %v1680_v6 = vpop.xlane.xlu1 %1679 }
 0xbd0   :  { %2835 = vrcp.f32 %v1680_v6 }
 0xbd1   :  { %v1677_v48 = vpop.xlane.xlu0 %1676 }
 0xbd2   :  { %2837 = vrcp.f32 %v1677_v48 }
 0xbd3   :  { %v1686_v50 = vpop.xlane.xlu1 %1685 }
 0xbd4   :  { %2839 = vrcp.f32 %v1686_v50 }
 0xbd5   :  { %v1683_v51 = vpop.xlane.xlu0 %1682  ;;  %v2832_v5 = vpop.eup %2831 }
 0xbd6   :  { %2841 = vrcp.f32 %v1683_v51  ;;  %v1694_v55 = vmul.f32 %v2832_v5, %v3301_v26  ;;  %v2209_v51 = vld [vmem:[%s3435_s7 + $0x18] sm:$0xff]  ;;  %v2208_v5 = vld [vmem:[%s3435_s7 + $0x10] sm:$0xff] }
 0xbd7   :  { %v1965_v57 = vpop.permute.xlu1 %1964 }
 0xbd9   :  { %v2834_v7 = vpop.eup %2833  ;;  %v1878_v52 = vpop.permute.xlu0 %1877 }
 0xbda   :  { %2708 = vmatprep.subr.mxu0 %v1878_v52  ;;  %v1692_v53 = vmul.f32 %v2834_v7, %v2818_v54  ;;  %v2207_v7 = vld [vmem:[%s3435_s7 + $0x8] sm:$0xff] }
 0xbdb   :  { %2709 = vmatpush3.msra.mxu0 %v1878_v52  ;;  %v2206_v52 = vld [vmem:[%s3435_s7] sm:$0xff] }
 0xbdc   :  { %2703 = vmatprep.mubr.msk.f32.mxu1 %vm551_vm2, %v1692_v53  ;;  %2720 = vmatprep.subr.mxu0 %v1113_v3  ;;  %v2304_v53 = vld [vmem:[%s3436_s8 + $0x38] sm:$0xff] }
 0xbdd   :  { %2704 = vmatmul.mubr.msk.f32.vlgmr.msra.gmra.mxu1 %vm551_vm2, %v1694_v55  ;;  %v2836_v56 = vpop.eup %2835  ;;  %v2303_v55 = vld [vmem:[%s3436_s8 + $0x30] sm:$0xff] }
 0xbde   :  { %2714 = vmatpush3.msra.mxu1 %v1967_v34  ;;  %v1698_v61 = vmul.f32 %v2836_v56, %v2820_v31  ;;  %v2302_v56 = vld [vmem:[%s3436_s8 + $0x28] sm:$0xff] }
 0xbdf   :  { %v2838_v59 = vpop.eup %2837  ;;  %2715 = vmatprep.subr.mxu1 %v1965_v57 }
 0xbe0   :  { %2716 = vmatpush3.msra.mxu1 %v1965_v57  ;;  %v1696_v60 = vmul.f32 %v2838_v59, %v2822_v33  ;;  %v2847_v33 = vld [vmem:[%s3430_s2] sm:$0xff] }
 0xbe1   :  { %v2840_v62 = vpop.eup %2839  ;;  %v2084_v34 = vrot.slane %v2847_v33, %v2083_v32  ;;  %2731 = vmatprep.subr.mxu1 %v2209_v51  ;;  %v2301_v57 = vld [vmem:[%s3436_s8 + $0x20] sm:$0xff] }
 0xbe2   :  { %2710 = vmatprep.mubr.msk.f32.mxu0 %vm551_vm2, %v1696_v60  ;;  %v1702_v27 = vmul.f32 %v2840_v62, %v2824_v36 }
 0xbe3   :  { %v2842_v63 = vpop.eup %2841  ;;  %2711 = vmatmul.mubr.msk.f32.vlgmr.msra.gmra.mxu0 %vm551_vm2, %v1698_v61 }
 0xbe4   :  { %v1700_v2 = vmul.f32 %v2842_v63, %v2826_v38  ;;  %2721 = vmatpush3.msra.mxu0 %v1113_v3 }
 0xbe5   :  { %2722 = vmatprep.subr.mxu0 %v1112_v4 }
 0xbe6   :  { %2717 = vmatprep.mubr.msk.f32.mxu1 %vm551_vm2, %v1700_v2  ;;  %2723 = vmatpush3.msra.mxu0 %v1112_v4 }
 0xbe7   :  { %2718 = vmatmul.mubr.msk.f32.vlgmr.msra.gmra.mxu1 %vm551_vm2, %v1702_v27  ;;  %2724 = vmatprep.subr.mxu0 %v1111_v8  ;;  %v38_v27 = vld [vmem:[%s3430_s2 + $0x8] sm:$0xf] }
 0xbe8   :  { %2725 = vmatpush3.msra.mxu0 %v1111_v8  ;;  %2732 = vmatpush3.msra.mxu1 %v2209_v51  ;;  %v2197_v3 = vrot.slane %v38_v27, %v89_v39  ;;  %v2203_v8 = vrot.slane %v38_v27, %v1154_v58  ;;  %v2299_v39 = vld [vmem:[%s3436_s8 + $0x10] sm:$0xff]  ;;  %v2298_v58 = vld [vmem:[%s3436_s8 + $0x8] sm:$0xff] }
 0xbe9   :  { %2726 = vmatprep.subr.mxu0 %v1110_v11  ;;  %2733 = vmatprep.subr.mxu1 %v2208_v5 }
 0xbea   :  { %2727 = vmatpush3.msra.mxu0 %v1110_v11  ;;  %2734 = vmatpush3.msra.mxu1 %v2208_v5 }
 0xbeb   :  { %2735 = vmatprep.subr.mxu1 %v2207_v7  ;;  %2742 = vmatprep.subr.mxu0 %v2304_v53 }
 0xbec   :  { %2736 = vmatpush3.msra.mxu1 %v2207_v7 }
 0xbed   :  { %2737 = vmatprep.subr.mxu1 %v2206_v52 }
 0xbee   :  { %2738 = vmatpush3.msra.mxu1 %v2206_v52 }
 0xc48   :  { %v2698_v9 = vpop.f32.mrf.mxu0 }
 0xc4a   :  { %v1781_v14 = vpop.f32.mrf.mxu0 }
 0xc9d   :  { %v2705_v10 = vpop.f32.mrf.mxu1 }
 0xc9e   :  { %2055 = vrot.lane.b32.xlu1 %v2705_v10, %s2875_s15 }
 0xc9f   :  { %v1868_v13 = vpop.f32.mrf.mxu1 }
 0xca0   :  { %2053 = vrot.lane.b32.xlu0 %v1868_v13, %s2875_s15 }
 0xca3   :  { %v2712_v16 = vpop.f32.mrf.mxu0 }
 0xca4   :  { %2063 = vrot.lane.b32.xlu1 %v2712_v16, %s2876_s16 }
 0xca5   :  { %v1955_v17 = vpop.f32.mrf.mxu0 }
 0xca6   :  { %2061 = vrot.lane.b32.xlu0 %v1955_v17, %s2876_s16 }
 0xca7   :  { %v2719_v18 = vpop.f32.mrf.mxu1 }
 0xca8   :  { %2071 = vrot.lane.b32.xlu1 %v2719_v18, %s2877_s17  ;;  %v2300_v18 = vld [vmem:[%s3436_s8 + $0x18] sm:$0xff] }
 0xca9   :  { %v2042_v19 = vpop.f32.mrf.mxu1 }
 0xcaa   :  { %2069 = vrot.lane.b32.xlu0 %v2042_v19, %s2877_s17  ;;  %v2297_v19 = vld [vmem:[%s3436_s8] sm:$0xff]  ;;  %s2878_s8 = smov [#allocation2]  }
 0xcab   :  { %s2400_s6 = sshll.u32 %s2878_s8, 4  ;;  %s2401_s6 = int_to_ptr.vmem [resolvable:$true] %s2400_s6 }
 0xcac   :  { %s2848_s30 = scalar_lea.vmem %s2401_s6, 256  ;;  %p2853_p1 = scmp.lt.s32.totalorder %s2401_s6, %s2401_s6 }
 0xcad   :  { %p2849_p0 = scmp.ne.s32.totalorder %s2401_s6, %s2848_s30  ;;  %p2854_p2 = scmp.lt.s32.totalorder %s2848_s30, %s2848_s30 }
 0xcaf   :  { %p2855_p3 = por %p2854_p2, %p2853_p1 }
 0xcb1   :  { %p2856_p4 = pnand %p2855_p3, %p2849_p0 }
 0xd10   :  { %v2056_v21 = vpop.permute.xlu1 %2055 }
 0xd11   :  { %v2076_v49 = vsel %vm206_vm1, %v2698_v9, %v2056_v21  ;;  %v2213_v21 = vrot.slane %v38_v27, %v1021_v15 }
 0xd12   :  { %v2054_v23 = vpop.permute.xlu0 %2053 }
 0xd13   :  { %v2075_v28 = vsel %vm206_vm1, %v1781_v14, %v2054_v23 }
 0xd16   :  { %v2064_v24 = vpop.permute.xlu1 %2063 }
 0xd17   :  { %v2078_v30 = vsel %vm551_vm2, %v2076_v49, %v2064_v24 }
 0xd18   :  { %v2062_v26 = vpop.permute.xlu0 %2061 }
 0xd19   :  { %v2077_v54 = vsel %vm551_vm2, %v2075_v28, %v2062_v26 }
 0xd1a   :  { %v2072_v29 = vpop.permute.xlu1 %2071 }
 0xd1b   :  { %v2080_v31 = vsel %vm1016_vm3, %v2078_v30, %v2072_v29 }
 0xd1c   :  { %v2070_v1 = vpop.permute.xlu0 %2069 }
 0xd1d   :  { %v2079_v0 = vsel %vm1016_vm3, %v2077_v54, %v2070_v1  ;;  %v2308_v54 = vrot.slane %v38_v27, %v2083_v32 }
 0xd1e   :  { %2728 = vmatprep.mubr.msk.f32.mxu0 %vm47_vm0, %v2079_v0 }
 0xd1f   :  { %2729 = vmatmul.mubr.msk.f32.vlgmr.msra.gmra.mxu0 %vm47_vm0, %v2080_v31 }
 0xd20   :  { %2743 = vmatpush3.msra.mxu0 %v2304_v53 }
 0xd21   :  { %2744 = vmatprep.subr.mxu0 %v2303_v55 }
 0xd22   :  { %2745 = vmatpush3.msra.mxu0 %v2303_v55 }
 0xd23   :  { %2746 = vmatprep.subr.mxu0 %v2302_v56 }
 0xd24   :  { %2747 = vmatpush3.msra.mxu0 %v2302_v56 }
 0xd25   :  { %2748 = vmatprep.subr.mxu0 %v2301_v57 }
 0xd26   :  { %2749 = vmatpush3.msra.mxu0 %v2301_v57 }
 0xd27   :  { %2750 = vmatprep.subr.mxu0 %v2300_v18 }
 0xd28   :  { %2751 = vmatpush3.msra.mxu0 %v2300_v18 }
 0xd29   :  { %2752 = vmatprep.subr.mxu0 %v2299_v39 }
 0xd2a   :  { %2753 = vmatpush3.msra.mxu0 %v2299_v39 }
 0xd2b   :  { %2754 = vmatprep.subr.mxu0 %v2298_v58 }
 0xd2c   :  { %2755 = vmatpush3.msra.mxu0 %v2298_v58 }
 0xd2d   :  { %2756 = vmatprep.subr.mxu0 %v2297_v19 }
 0xd2e   :  { %2757 = vmatpush3.msra.mxu0 %v2297_v19 }
 0xddf   :  { %v2730_v35 = vpop.f32.mrf.mxu0 }
 0xde0   :  { %v2163_v36 = vadd.f32 %v2730_v35, %v2084_v34 }
 0xde1   :  { %v2157_v37 = vpop.f32.mrf.mxu0 }
 0xde2   :  { %v3358_v38 = vadd.f32 %v2163_v36, %v3154_v20  ;;  %v2158_v40 = vadd.f32 %v2157_v37, %v2084_v34 }
 0xde4   :  { %v3361_v41 = vadd.f32 %v2158_v40, %v3157_v22  ;;  %v2171_v42 = vsel %vm47_vm0, %v3358_v38, 0.0 }
 0xde5   :  { %2172 = vadd.xlane.f32.xlu1 %v2171_v42 }
 0xde6   :  { %v2168_v43 = vsel %vm47_vm0, %v3361_v41, 0.0 }
 0xde7   :  { %2169 = vadd.xlane.f32.xlu0 %v2168_v43 }
 0xe6e   :  { %v2173_v44 = vpop.xlane.xlu1 %2172 }
 0xe6f   :  { %v2175_v45 = vmul.f32 0.03125, %v2173_v44 }
 0xe70   :  { %v2170_v46 = vpop.xlane.xlu0 %2169 }
 0xe71   :  { %v2174_v47 = vmul.f32 0.03125, %v2170_v46  ;;  %v2177_v12 = vsub.f32 %v3358_v38, %v2175_v45 }
 0xe73   :  { %v2176_v20 = vsub.f32 %v3361_v41, %v2174_v47  ;;  %v2179_v48 = vmul.f32 %v2177_v12, %v2177_v12 }
 0xe75   :  { %v2178_v6 = vmul.f32 %v2176_v20, %v2176_v20  ;;  %v2183_v50 = vsel %vm47_vm0, %v2179_v48, 0.0 }
 0xe77   :  { %v2180_v22 = vsel %vm47_vm0, %v2178_v6, 0.0 }
 0xe78   :  { %2181 = vadd.xlane.f32.xlu0 %v2180_v22 }
 0xe7c   :  { %2184 = vadd.xlane.f32.xlu0 %v2183_v50 }
 0xf01   :  { %v2182_v59 = vpop.xlane.xlu0 %2181 }
 0xf02   :  { %v2186_v60 = vmul.f32 0.03125, %v2182_v59 }
 0xf04   :  { %v2188_v61 = vadd.f32 1e-05, %v2186_v60 }
 0xf05   :  { %v2185_v62 = vpop.xlane.xlu0 %2184 }
 0xf06   :  { %2843 = vrsqrt.f32 %v2188_v61  ;;  %v2187_v63 = vmul.f32 0.03125, %v2185_v62 }
 0xf08   :  { %v2189_v2 = vadd.f32 1e-05, %v2187_v63 }
 0xf0a   :  { %2845 = vrsqrt.f32 %v2189_v2 }
 0xf13   :  { %v2844_v4 = vpop.eup %2843 }
 0xf14   :  { %v2192_v9 = vmul.f32 %v2844_v4, %v2176_v20 }
 0xf16   :  { %v2198_v10 = vmul.f32 %v2197_v3, %v2192_v9 }
 0xf17   :  { %v2846_v11 = vpop.eup %2845 }
 0xf18   :  { %v2193_v13 = vmul.f32 %v2846_v11, %v2177_v12  ;;  %v2204_v14 = vadd.f32 %v2203_v8, %v2198_v10 }
 0xf1a   :  { %2739 = vmatprep.mubr.msk.f32.mxu1 %vm47_vm0, %v2204_v14  ;;  %v2199_v16 = vmul.f32 %v2197_v3, %v2193_v13 }
 0xf1c   :  { %v2205_v17 = vadd.f32 %v2203_v8, %v2199_v16 }
 0xf1e   :  { %2740 = vmatmul.mubr.msk.f32.vlgmr.msra.gmra.mxu1 %vm47_vm0, %v2205_v17 }
 0xfde   :  { %v2741_v23 = vpop.f32.mrf.mxu1 }
 0xfdf   :  { %v2292_v24 = vadd.f32 %v2741_v23, %v2213_v21 }
 0xfe0   :  { %v2286_v26 = vpop.f32.mrf.mxu1 }
 0xfe1   :  { %v2287_v28 = vadd.f32 %v2286_v26, %v2213_v21  ;;  %v2296_v49 = vmax.f32 %v2292_v24, 0.0 }
 0xfe3   :  { %v2295_v29 = vmax.f32 %v2287_v28, 0.0 }
 0xfe5   :  { %2758 = vmatprep.mubr.msk.f32.mxu0 %vm2309_vm4, %v2295_v29 }
 0xfe6   :  { %2759 = vmatmul.mubr.msk.f32.vlgmr.msra.gmra.mxu0 %vm2309_vm4, %v2296_v49 }
0x10a6   :  { %v2760_v1 = vpop.f32.mrf.mxu0 }
0x10a7   :  { %v2388_v30 = vadd.f32 %v2760_v1, %v2308_v54 }
0x10a8   :  { %v2382_v0 = vpop.f32.mrf.mxu0 }
0x10a9   :  { %v2392_v31 = vadd.f32 %v2388_v30, %v3358_v38  ;;  %v2383_v15 = vadd.f32 %v2382_v0, %v2308_v54 }
0x10ab   :  { %2394 = vst.msk [vmem:[#allocation2 + $0x8] sm:$0xff] %vm47_vm0, %v2392_v31  ;;  %v2391_v33 = vadd.f32 %v2383_v15, %v3361_v41 }
0x10ad   :  { %2393 = vst.msk [vmem:[#allocation2] sm:$0xff] %vm47_vm0, %v2391_v33 }
0x10ae   :  { %2859 = shalt.err (!%p2856_p4)
}
0x10af   :  { %s2879_s10 = smov 128  }
0x10b0   :  { %2406 = dma.vmem_to_hbm [thread:$0]  %s2401_s6, 256, %s3437_s9, [#allocation3], %s2879_s10, %s2879_s10, %s2875_s15  }
0x10b1   :  { %2868 = dma.done.wait [#allocation3], 256  }
0x10b2   :  { %2869 = vsyncadd [#allocation3], 4294967040 }
0x10b3   :  { %2410 = vsyncpa [#allocation3], 1 }

</bundles_post_ra>
